<compile_context>
chip_gen: v6e
topology: v6e:2x2x1
jax: 0.10.0
libtpu: 0.0.40
codegen_flags: <defaults>
</compile_context>

<pallas_src>
import functools

import jax
import jax.numpy as jnp
import numpy as np
from jax import lax
from jax.experimental import pallas as pl
from jax.experimental.pallas import tpu as pltpu

PAD_IDX = 0  # stands in for char2id[' '] (padding_idx of the torch Embedding)


# ----------------------------------------------------------------------------
# Pallas kernel: batched attention-decoder forward for one batch block.
# ----------------------------------------------------------------------------
def _decoder_kernel(
    emb_ref,      # (Bb, T, E)
    hs_ref,       # (Bb, S, H)
    h0_ref,       # (Bb, 1, H)
    w_i_ref,      # (E, 3H)  packed input weights  (gate order r, z, n)
    w_h_ref,      # (H, 3H)  packed hidden weights (gate order r, z, n)
    b_i_ref,      # (1, 3H)
    b_h_ref,      # (1, 3H)
    w_lo_ref,     # (H, V)   hidden2linear weight for the GRU-output half
    w_lc_ref,     # (H, V)   hidden2linear weight for the context half
    b_l_ref,      # (1, V)
    out_ref,      # (Bb, T, V)
    state_ref,    # (Bb, 1, H)
    aw_ref,       # (Bb, T, S)  -- (T,S) orientation; wrapper transposes to (B,S,T)
    gi_scratch,   # VMEM (Bb, T, 3H) f32
    go_scratch,   # VMEM (Bb, T, H)  f32
):
    Bb, T, H = go_scratch.shape
    E = emb_ref.shape[-1]
    V = out_ref.shape[-1]

    # ---- hoisted input-gate projections for all (batch, time) at once -------
    emb2 = emb_ref[...].reshape(Bb * T, E)                       # (Bb*T, E)
    gi2 = jnp.dot(emb2, w_i_ref[...],
                  preferred_element_type=jnp.float32) + b_i_ref[...]
    gi_scratch[...] = gi2.reshape(Bb, T, 3 * H)

    w_h = w_h_ref[...]        # (H, 3H)
    b_h = b_h_ref[...]        # (1, 3H)
    h0 = h0_ref[...][:, 0, :]  # (Bb, H)

    # ---- GRU recurrence (single fused hidden matmul per step, batched) ------
    def step(t, h_prev):                                          # h_prev (Bb, H)
        gi_t = gi_scratch[:, pl.ds(t, 1), :][:, 0, :]             # (Bb, 3H)
        gh = jnp.dot(h_prev, w_h,
                     preferred_element_type=jnp.float32) + b_h    # (Bb, 3H)
        r = jax.nn.sigmoid(gi_t[:, 0:H] + gh[:, 0:H])
        z = jax.nn.sigmoid(gi_t[:, H:2 * H] + gh[:, H:2 * H])
        n = jnp.tanh(gi_t[:, 2 * H:] + r * gh[:, 2 * H:])
        h_new = (1.0 - z) * n + z * h_prev
        go_scratch[:, pl.ds(t, 1), :] = h_new[:, None, :]
        return h_new

    h_final = lax.fori_loop(0, T, step, h0, unroll=True)
    state_ref[...] = h_final[:, None, :]

    gru_out = go_scratch[...]    # (Bb, T, H)
    hs = hs_ref[...]             # (Bb, S, H)

    # ---- attention scores, (T, S) orientation (lane axis = S) ---------------
    s = jnp.einsum("bth,bsh->bts", gru_out, hs,
                   preferred_element_type=jnp.float32)            # (Bb, T, S)

    # softmax over the encoder axis S (== torch Softmax(dim=1) on (B,S,T))
    s_max = jnp.max(s, axis=-1, keepdims=True)
    e = jnp.exp(s - s_max)
    denom = jnp.sum(e, axis=-1, keepdims=True)
    aw = e * pl.reciprocal(denom, approx=True)                    # (Bb, T, S)
    aw_ref[...] = aw

    # ---- context: c[b,t,:] = sum_s aw[b,t,s] * hs[b,s,:] ---------------------
    c = jnp.einsum("bts,bsh->bth", aw, hs,
                   preferred_element_type=jnp.float32)            # (Bb, T, H)

    # ---- hidden2linear on concat([gru_out, c], -1) via split weights --------
    go2 = gru_out.reshape(Bb * T, H)
    c2 = c.reshape(Bb * T, H)
    out2 = (jnp.dot(go2, w_lo_ref[...], preferred_element_type=jnp.float32)
            + jnp.dot(c2, w_lc_ref[...], preferred_element_type=jnp.float32)
            + b_l_ref[...])
    out_ref[...] = out2.reshape(Bb, T, V)


# ----------------------------------------------------------------------------
# Wrapper: parameter packing + pallas_call
# ----------------------------------------------------------------------------
@functools.partial(jax.jit, static_argnames=("batch_block",))
def attention_decoder_forward(sequence, hs, h, params, *, batch_block=None):
    emb = params["emb_table"][sequence]          # (B, T, E) -- gather glue
    B, T, E = emb.shape
    S, H = hs.shape[1], hs.shape[2]
    V = params["b_lin"].shape[0]

    Bb = B if batch_block is None else batch_block
    assert B % Bb == 0, "batch_block must divide the batch size"
    grid = (B // Bb,)

    h0 = jnp.transpose(h, (1, 0, 2))             # (B, 1, H)

    # Pack GRU weights (torch gate order r, z, n preserved along the 3H axis).
    w_i = params["w_ih"].T                       # (E, 3H)
    w_h = params["w_hh"].T                       # (H, 3H)
    b_i = params["b_ih"][None]                   # (1, 3H)
    b_h = params["b_hh"][None]                   # (1, 3H)

    # hidden2linear: y = [gru_out, c] @ W^T + b  -> split W^T (avoids lane concat).
    w_lin_t = params["w_lin"].T                  # (2H, V)
    w_lo, w_lc = w_lin_t[:H], w_lin_t[H:]        # (H, V) each
    b_l = params["b_lin"][None]                  # (1, V)

    def bcast(shape):  # constant (weight) block, same tile every grid step
        return pl.BlockSpec(shape, lambda b: (0, 0))

    in_specs = [
        pl.BlockSpec((Bb, T, E), lambda b: (b, 0, 0)),   # emb
        pl.BlockSpec((Bb, S, H), lambda b: (b, 0, 0)),   # hs
        pl.BlockSpec((Bb, 1, H), lambda b: (b, 0, 0)),   # h0
        bcast((E, 3 * H)), bcast((H, 3 * H)),            # w_i, w_h
        bcast((1, 3 * H)), bcast((1, 3 * H)),            # b_i, b_h
        bcast((H, V)), bcast((H, V)), bcast((1, V)),     # w_lo, w_lc, b_l
    ]
    out_specs = [
        pl.BlockSpec((Bb, T, V), lambda b: (b, 0, 0)),
        pl.BlockSpec((Bb, 1, H), lambda b: (b, 0, 0)),
        pl.BlockSpec((Bb, T, S), lambda b: (b, 0, 0)),
    ]
    out_shape = (
        jax.ShapeDtypeStruct((B, T, V), jnp.float32),
        jax.ShapeDtypeStruct((B, 1, H), jnp.float32),
        jax.ShapeDtypeStruct((B, T, S), jnp.float32),
    )

    out, state_b, aw_ts = pl.pallas_call(
        _decoder_kernel,
        out_shape=out_shape,
        grid_spec=pltpu.PrefetchScalarGridSpec(
            num_scalar_prefetch=0,
            grid=grid,
            in_specs=in_specs,
            out_specs=out_specs,
            scratch_shapes=[
                pltpu.VMEM((Bb, T, 3 * H), jnp.float32),   # gi (hoisted gate inputs)
                pltpu.VMEM((Bb, T, H), jnp.float32),       # gru outputs
            ],
        ),
        compiler_params=pltpu.CompilerParams(
            dimension_semantics=("parallel",)),            # batch blocks independent
    )(emb, hs, h0, w_i, w_h, b_i, b_h, w_lo, w_lc, b_l)

    state = jnp.transpose(state_b, (1, 0, 2))    # (1, B, H) like torch GRU state
    aw = jnp.transpose(aw_ts, (0, 2, 1))         # (B, S, T) like torch bmm output
    return out, state, aw


# ----------------------------------------------------------------------------
# Pure-JAX reference (mirrors the torch module) for correctness checking.
# ----------------------------------------------------------------------------
def reference_forward(sequence, hs, h, params):
    emb = params["emb_table"][sequence]
    w_ih, w_hh = params["w_ih"], params["w_hh"]
    b_ih, b_hh = params["b_ih"], params["b_hh"]

    def cell(h_prev, x):
        gi = x @ w_ih.T + b_ih
        gh = h_prev @ w_hh.T + b_hh
        i_r, i_z, i_n = jnp.split(gi, 3, axis=-1)
        h_r, h_z, h_n = jnp.split(gh, 3, axis=-1)
        r = jax.nn.sigmoid(i_r + h_r)
        z = jax.nn.sigmoid(i_z + h_z)
        n = jnp.tanh(i_n + r * h_n)
        h_new = (1.0 - z) * n + z * h_prev
        return h_new, h_new

    state, outs = lax.scan(cell, h[0], jnp.transpose(emb, (1, 0, 2)))
    output = jnp.transpose(outs, (1, 0, 2))                 # (B, T, H)
    s = jnp.einsum("bsh,bth->bst", hs, output)
    aw = jax.nn.softmax(s, axis=1)
    c = jnp.einsum("bst,bsh->bth", aw, hs)
    cat = jnp.concatenate([output, c], axis=-1)
    out = cat @ params["w_lin"].T + params["b_lin"]
    return out, state[None], aw


# ----------------------------------------------------------------------------
def make_params(key, vocab_size, embedding_dim, hidden_dim):
    ks = jax.random.split(key, 7)
    emb_table = 0.1 * jax.random.normal(ks[0], (vocab_size, embedding_dim), jnp.float32)
    emb_table = emb_table.at[PAD_IDX].set(0.0)   # padding_idx row is zero
    return dict(
        emb_table=emb_table,
        w_ih=0.1 * jax.random.normal(ks[1], (3 * hidden_dim, embedding_dim), jnp.float32),
        w_hh=0.1 * jax.random.normal(ks[2], (3 * hidden_dim, hidden_dim), jnp.float32),
        b_ih=0.1 * jax.random.normal(ks[3], (3 * hidden_dim,), jnp.float32),
        b_hh=0.1 * jax.random.normal(ks[4], (3 * hidden_dim,), jnp.float32),
        w_lin=0.1 * jax.random.normal(ks[5], (vocab_size, 2 * hidden_dim), jnp.float32),
        b_lin=0.1 * jax.random.normal(ks[6], (vocab_size,), jnp.float32),
    )


if __name__ == "__main__":
    vocab_size, embedding_dim, hidden_dim = 16, 32, 32
    batch_size, dec_len, enc_len = 2, 8, 16

    key = jax.random.PRNGKey(0)
    k_par, k_seq, k_hs, k_h = jax.random.split(key, 4)

    params = make_params(k_par, vocab_size, embedding_dim, hidden_dim)
    sequence = jax.random.randint(k_seq, (batch_size, dec_len), 0, vocab_size, jnp.int32)
    hs = jax.random.normal(k_hs, (batch_size, enc_len, hidden_dim), jnp.float32)
    h = jax.random.normal(k_h, (1, batch_size, hidden_dim), jnp.float32)

    out, state, aw = attention_decoder_forward(sequence, hs, h, params)
    jax.block_until_ready((out, state, aw))

    ref_out, ref_state, ref_aw = reference_forward(sequence, hs, h, params)
    np.testing.assert_allclose(np.asarray(out), np.asarray(ref_out), rtol=5e-3, atol=5e-3)
    np.testing.assert_allclose(np.asarray(state), np.asarray(ref_state), rtol=5e-3, atol=5e-3)
    np.testing.assert_allclose(np.asarray(aw), np.asarray(ref_aw), rtol=5e-3, atol=5e-3)

    print("KERNEL_OK")
</pallas_src>

<mosaic_0001>
module attributes {stable_mosaic.version = 11 : i64} {
  func.func @_decoder_kernel(%arg0: i32, %arg1: memref<2x8x32xf32, #tpu.memory_space<vmem>>, %arg2: memref<2x16x32xf32, #tpu.memory_space<vmem>>, %arg3: memref<2x1x32xf32, #tpu.memory_space<vmem>>, %arg4: memref<32x96xf32, #tpu.memory_space<vmem>>, %arg5: memref<32x96xf32, #tpu.memory_space<vmem>>, %arg6: memref<1x96xf32, #tpu.memory_space<vmem>>, %arg7: memref<1x96xf32, #tpu.memory_space<vmem>>, %arg8: memref<32x16xf32, #tpu.memory_space<vmem>>, %arg9: memref<32x16xf32, #tpu.memory_space<vmem>>, %arg10: memref<1x16xf32, #tpu.memory_space<vmem>>, %arg11: memref<2x8x16xf32, #tpu.memory_space<vmem>>, %arg12: memref<2x1x32xf32, #tpu.memory_space<vmem>>, %arg13: memref<2x8x16xf32, #tpu.memory_space<vmem>>, %arg14: memref<2x8x96xf32, #tpu.memory_space<vmem>>, %arg15: memref<2x8x32xf32, #tpu.memory_space<vmem>>) attributes {dimension_semantics = [#tpu.dimension_semantics<parallel>], iteration_bounds = array<i64: 1>, scalar_prefetch = 0 : i64, scratch_operands = 2 : i64, tpu.core_type = #tpu.core_type<tc>, window_params = [{transform_indices = @transform_0, window_bounds = array<i64: 2, 8, 32>}, {transform_indices = @transform_1, window_bounds = array<i64: 2, 16, 32>}, {transform_indices = @transform_2, window_bounds = array<i64: 2, 1, 32>}, {pipeline_mode = #tpu.pipeline_mode<synchronous>, transform_indices = @transform_3, window_bounds = array<i64: 32, 96>}, {pipeline_mode = #tpu.pipeline_mode<synchronous>, transform_indices = @transform_4, window_bounds = array<i64: 32, 96>}, {pipeline_mode = #tpu.pipeline_mode<synchronous>, transform_indices = @transform_5, window_bounds = array<i64: 1, 96>}, {pipeline_mode = #tpu.pipeline_mode<synchronous>, transform_indices = @transform_6, window_bounds = array<i64: 1, 96>}, {pipeline_mode = #tpu.pipeline_mode<synchronous>, transform_indices = @transform_7, window_bounds = array<i64: 32, 16>}, {pipeline_mode = #tpu.pipeline_mode<synchronous>, transform_indices = @transform_8, window_bounds = array<i64: 32, 16>}, {pipeline_mode = #tpu.pipeline_mode<synchronous>, transform_indices = @transform_9, window_bounds = array<i64: 1, 16>}, {transform_indices = @transform_10, window_bounds = array<i64: 2, 8, 16>}, {transform_indices = @transform_11, window_bounds = array<i64: 2, 1, 32>}, {transform_indices = @transform_12, window_bounds = array<i64: 2, 8, 16>}]} {
    %c0 = arith.constant 0 : index
    %c0_0 = arith.constant 0 : index
    %c0_1 = arith.constant 0 : index
    %0 = vector.load %arg1[%c0, %c0_0, %c0_1] : memref<2x8x32xf32, #tpu.memory_space<vmem>>, vector<2x8x32xf32>
    %1 = vector.shape_cast %0 : vector<2x8x32xf32> to vector<16x32xf32>
    %c0_2 = arith.constant 0 : index
    %c0_3 = arith.constant 0 : index
    %2 = vector.load %arg4[%c0_2, %c0_3] : memref<32x96xf32, #tpu.memory_space<vmem>>, vector<32x96xf32>
    %cst = arith.constant dense<0.000000e+00> : vector<16x96xf32>
    %3 = tpu.matmul %1, %2, %cst {dimension_numbers = #tpu.dot_dimension_numbers<[1], [0], [0], [1], [0, 0, 1, 1], [], []>} : vector<16x32xf32>, vector<32x96xf32>, vector<16x96xf32> -> vector<16x96xf32>
    %c0_4 = arith.constant 0 : index
    %c0_5 = arith.constant 0 : index
    %4 = vector.load %arg6[%c0_4, %c0_5] : memref<1x96xf32, #tpu.memory_space<vmem>>, vector<1x96xf32>
    %5 = vector.broadcast %4 : vector<1x96xf32> to vector<16x96xf32>
    %6 = arith.addf %3, %5 : vector<16x96xf32>
    %7 = vector.shape_cast %6 : vector<16x96xf32> to vector<2x8x96xf32>
    %c0_6 = arith.constant 0 : index
    %c0_7 = arith.constant 0 : index
    %c0_8 = arith.constant 0 : index
    %8 = vector.load %arg14[%c0_6, %c0_7, %c0_8] : memref<2x8x96xf32, #tpu.memory_space<vmem>>, vector<2x8x96xf32>
    tpu.vector_store %arg14[%c0_6, %c0_7, %c0_8], %7 {strides = array<i32>} : memref<2x8x96xf32, #tpu.memory_space<vmem>>, vector<2x8x96xf32>,
    %c0_9 = arith.constant 0 : index
    %c0_10 = arith.constant 0 : index
    %9 = vector.load %arg5[%c0_9, %c0_10] : memref<32x96xf32, #tpu.memory_space<vmem>>, vector<32x96xf32>
    %c0_11 = arith.constant 0 : index
    %c0_12 = arith.constant 0 : index
    %10 = vector.load %arg7[%c0_11, %c0_12] : memref<1x96xf32, #tpu.memory_space<vmem>>, vector<1x96xf32>
    %c0_13 = arith.constant 0 : index
    %c0_14 = arith.constant 0 : index
    %c0_15 = arith.constant 0 : index
    %11 = vector.load %arg3[%c0_13, %c0_14, %c0_15] : memref<2x1x32xf32, #tpu.memory_space<vmem>>, vector<2x1x32xf32>
    %12 = vector.shape_cast %11 : vector<2x1x32xf32> to vector<2x32xf32>
    %c0_i32 = arith.constant 0 : i32
    %c0_16 = arith.constant 0 : index
    %13 = arith.index_cast %c0_i32 : i32 to index
    %c0_17 = arith.constant 0 : index
    %14 = vector.load %arg14[%c0_16, %13, %c0_17] : memref<2x8x96xf32, #tpu.memory_space<vmem>>, vector<2x1x96xf32>
    %15 = vector.shape_cast %14 : vector<2x1x96xf32> to vector<2x96xf32>
    %cst_18 = arith.constant dense<0.000000e+00> : vector<2x96xf32>
    %16 = tpu.matmul %12, %9, %cst_18 {dimension_numbers = #tpu.dot_dimension_numbers<[1], [0], [0], [1], [0, 0, 1, 1], [], []>} : vector<2x32xf32>, vector<32x96xf32>, vector<2x96xf32> -> vector<2x96xf32>
    %17 = vector.broadcast %10 : vector<1x96xf32> to vector<2x96xf32>
    %18 = arith.addf %16, %17 : vector<2x96xf32>
    %19 = vector.extract_strided_slice %15 {offsets = [0, 0], sizes = [2, 32], strides = [1, 1]} : vector<2x96xf32> to vector<2x32xf32>
    %20 = vector.extract_strided_slice %18 {offsets = [0, 0], sizes = [2, 32], strides = [1, 1]} : vector<2x96xf32> to vector<2x32xf32>
    %21 = arith.addf %19, %20 : vector<2x32xf32>
    %22 = arith.negf %21 : vector<2x32xf32>
    %23 = math.exp %22 : vector<2x32xf32>
    %cst_19 = arith.constant 1.000000e+00 : f32
    %24 = vector.broadcast %cst_19 : f32 to vector<2x32xf32>
    %25 = arith.addf %24, %23 : vector<2x32xf32>
    %26 = arith.divf %24, %25 : vector<2x32xf32>
    %27 = vector.extract_strided_slice %15 {offsets = [0, 32], sizes = [2, 32], strides = [1, 1]} : vector<2x96xf32> to vector<2x32xf32>
    %28 = vector.extract_strided_slice %18 {offsets = [0, 32], sizes = [2, 32], strides = [1, 1]} : vector<2x96xf32> to vector<2x32xf32>
    %29 = arith.addf %27, %28 : vector<2x32xf32>
    %30 = arith.negf %29 : vector<2x32xf32>
    %31 = math.exp %30 : vector<2x32xf32>
    %cst_20 = arith.constant 1.000000e+00 : f32
    %32 = vector.broadcast %cst_20 : f32 to vector<2x32xf32>
    %33 = arith.addf %32, %31 : vector<2x32xf32>
    %34 = arith.divf %32, %33 : vector<2x32xf32>
    %35 = vector.extract_strided_slice %15 {offsets = [0, 64], sizes = [2, 32], strides = [1, 1]} : vector<2x96xf32> to vector<2x32xf32>
    %36 = vector.extract_strided_slice %18 {offsets = [0, 64], sizes = [2, 32], strides = [1, 1]} : vector<2x96xf32> to vector<2x32xf32>
    %37 = arith.mulf %26, %36 : vector<2x32xf32>
    %38 = arith.addf %35, %37 : vector<2x32xf32>
    %39 = math.tanh %38 : vector<2x32xf32>
    %cst_21 = arith.constant 1.000000e+00 : f32
    %40 = vector.broadcast %cst_21 : f32 to vector<2x32xf32>
    %41 = arith.subf %40, %34 : vector<2x32xf32>
    %42 = arith.mulf %41, %39 : vector<2x32xf32>
    %43 = arith.mulf %34, %12 : vector<2x32xf32>
    %44 = arith.addf %42, %43 : vector<2x32xf32>
    %45 = vector.shape_cast %44 : vector<2x32xf32> to vector<2x1x32xf32>
    %c0_22 = arith.constant 0 : index
    %46 = arith.index_cast %c0_i32 : i32 to index
    %c0_23 = arith.constant 0 : index
    %47 = vector.load %arg15[%c0_22, %46, %c0_23] : memref<2x8x32xf32, #tpu.memory_space<vmem>>, vector<2x1x32xf32>
    tpu.vector_store %arg15[%c0_22, %46, %c0_23], %45 {strides = array<i32>} : memref<2x8x32xf32, #tpu.memory_space<vmem>>, vector<2x1x32xf32>,
    %c1_i32 = arith.constant 1 : i32
    %c0_24 = arith.constant 0 : index
    %48 = arith.index_cast %c1_i32 : i32 to index
    %c0_25 = arith.constant 0 : index
    %49 = vector.load %arg14[%c0_24, %48, %c0_25] : memref<2x8x96xf32, #tpu.memory_space<vmem>>, vector<2x1x96xf32>
    %50 = vector.shape_cast %49 : vector<2x1x96xf32> to vector<2x96xf32>
    %cst_26 = arith.constant dense<0.000000e+00> : vector<2x96xf32>
    %51 = tpu.matmul %44, %9, %cst_26 {dimension_numbers = #tpu.dot_dimension_numbers<[1], [0], [0], [1], [0, 0, 1, 1], [], []>} : vector<2x32xf32>, vector<32x96xf32>, vector<2x96xf32> -> vector<2x96xf32>
    %52 = vector.broadcast %10 : vector<1x96xf32> to vector<2x96xf32>
    %53 = arith.addf %51, %52 : vector<2x96xf32>
    %54 = vector.extract_strided_slice %50 {offsets = [0, 0], sizes = [2, 32], strides = [1, 1]} : vector<2x96xf32> to vector<2x32xf32>
    %55 = vector.extract_strided_slice %53 {offsets = [0, 0], sizes = [2, 32], strides = [1, 1]} : vector<2x96xf32> to vector<2x32xf32>
    %56 = arith.addf %54, %55 : vector<2x32xf32>
    %57 = arith.negf %56 : vector<2x32xf32>
    %58 = math.exp %57 : vector<2x32xf32>
    %cst_27 = arith.constant 1.000000e+00 : f32
    %59 = vector.broadcast %cst_27 : f32 to vector<2x32xf32>
    %60 = arith.addf %59, %58 : vector<2x32xf32>
    %61 = arith.divf %59, %60 : vector<2x32xf32>
    %62 = vector.extract_strided_slice %50 {offsets = [0, 32], sizes = [2, 32], strides = [1, 1]} : vector<2x96xf32> to vector<2x32xf32>
    %63 = vector.extract_strided_slice %53 {offsets = [0, 32], sizes = [2, 32], strides = [1, 1]} : vector<2x96xf32> to vector<2x32xf32>
    %64 = arith.addf %62, %63 : vector<2x32xf32>
    %65 = arith.negf %64 : vector<2x32xf32>
    %66 = math.exp %65 : vector<2x32xf32>
    %cst_28 = arith.constant 1.000000e+00 : f32
    %67 = vector.broadcast %cst_28 : f32 to vector<2x32xf32>
    %68 = arith.addf %67, %66 : vector<2x32xf32>
    %69 = arith.divf %67, %68 : vector<2x32xf32>
    %70 = vector.extract_strided_slice %50 {offsets = [0, 64], sizes = [2, 32], strides = [1, 1]} : vector<2x96xf32> to vector<2x32xf32>
    %71 = vector.extract_strided_slice %53 {offsets = [0, 64], sizes = [2, 32], strides = [1, 1]} : vector<2x96xf32> to vector<2x32xf32>
    %72 = arith.mulf %61, %71 : vector<2x32xf32>
    %73 = arith.addf %70, %72 : vector<2x32xf32>
    %74 = math.tanh %73 : vector<2x32xf32>
    %cst_29 = arith.constant 1.000000e+00 : f32
    %75 = vector.broadcast %cst_29 : f32 to vector<2x32xf32>
    %76 = arith.subf %75, %69 : vector<2x32xf32>
    %77 = arith.mulf %76, %74 : vector<2x32xf32>
    %78 = arith.mulf %69, %44 : vector<2x32xf32>
    %79 = arith.addf %77, %78 : vector<2x32xf32>
    %80 = vector.shape_cast %79 : vector<2x32xf32> to vector<2x1x32xf32>
    %c0_30 = arith.constant 0 : index
    %81 = arith.index_cast %c1_i32 : i32 to index
    %c0_31 = arith.constant 0 : index
    %82 = vector.load %arg15[%c0_30, %81, %c0_31] : memref<2x8x32xf32, #tpu.memory_space<vmem>>, vector<2x1x32xf32>
    tpu.vector_store %arg15[%c0_30, %81, %c0_31], %80 {strides = array<i32>} : memref<2x8x32xf32, #tpu.memory_space<vmem>>, vector<2x1x32xf32>,
    %c2_i32 = arith.constant 2 : i32
    %c0_32 = arith.constant 0 : index
    %83 = arith.index_cast %c2_i32 : i32 to index
    %c0_33 = arith.constant 0 : index
    %84 = vector.load %arg14[%c0_32, %83, %c0_33] : memref<2x8x96xf32, #tpu.memory_space<vmem>>, vector<2x1x96xf32>
    %85 = vector.shape_cast %84 : vector<2x1x96xf32> to vector<2x96xf32>
    %cst_34 = arith.constant dense<0.000000e+00> : vector<2x96xf32>
    %86 = tpu.matmul %79, %9, %cst_34 {dimension_numbers = #tpu.dot_dimension_numbers<[1], [0], [0], [1], [0, 0, 1, 1], [], []>} : vector<2x32xf32>, vector<32x96xf32>, vector<2x96xf32> -> vector<2x96xf32>
    %87 = vector.broadcast %10 : vector<1x96xf32> to vector<2x96xf32>
    %88 = arith.addf %86, %87 : vector<2x96xf32>
    %89 = vector.extract_strided_slice %85 {offsets = [0, 0], sizes = [2, 32], strides = [1, 1]} : vector<2x96xf32> to vector<2x32xf32>
    %90 = vector.extract_strided_slice %88 {offsets = [0, 0], sizes = [2, 32], strides = [1, 1]} : vector<2x96xf32> to vector<2x32xf32>
    %91 = arith.addf %89, %90 : vector<2x32xf32>
    %92 = arith.negf %91 : vector<2x32xf32>
    %93 = math.exp %92 : vector<2x32xf32>
    %cst_35 = arith.constant 1.000000e+00 : f32
    %94 = vector.broadcast %cst_35 : f32 to vector<2x32xf32>
    %95 = arith.addf %94, %93 : vector<2x32xf32>
    %96 = arith.divf %94, %95 : vector<2x32xf32>
    %97 = vector.extract_strided_slice %85 {offsets = [0, 32], sizes = [2, 32], strides = [1, 1]} : vector<2x96xf32> to vector<2x32xf32>
    %98 = vector.extract_strided_slice %88 {offsets = [0, 32], sizes = [2, 32], strides = [1, 1]} : vector<2x96xf32> to vector<2x32xf32>
    %99 = arith.addf %97, %98 : vector<2x32xf32>
    %100 = arith.negf %99 : vector<2x32xf32>
    %101 = math.exp %100 : vector<2x32xf32>
    %cst_36 = arith.constant 1.000000e+00 : f32
    %102 = vector.broadcast %cst_36 : f32 to vector<2x32xf32>
    %103 = arith.addf %102, %101 : vector<2x32xf32>
    %104 = arith.divf %102, %103 : vector<2x32xf32>
    %105 = vector.extract_strided_slice %85 {offsets = [0, 64], sizes = [2, 32], strides = [1, 1]} : vector<2x96xf32> to vector<2x32xf32>
    %106 = vector.extract_strided_slice %88 {offsets = [0, 64], sizes = [2, 32], strides = [1, 1]} : vector<2x96xf32> to vector<2x32xf32>
    %107 = arith.mulf %96, %106 : vector<2x32xf32>
    %108 = arith.addf %105, %107 : vector<2x32xf32>
    %109 = math.tanh %108 : vector<2x32xf32>
    %cst_37 = arith.constant 1.000000e+00 : f32
    %110 = vector.broadcast %cst_37 : f32 to vector<2x32xf32>
    %111 = arith.subf %110, %104 : vector<2x32xf32>
    %112 = arith.mulf %111, %109 : vector<2x32xf32>
    %113 = arith.mulf %104, %79 : vector<2x32xf32>
    %114 = arith.addf %112, %113 : vector<2x32xf32>
    %115 = vector.shape_cast %114 : vector<2x32xf32> to vector<2x1x32xf32>
    %c0_38 = arith.constant 0 : index
    %116 = arith.index_cast %c2_i32 : i32 to index
    %c0_39 = arith.constant 0 : index
    %117 = vector.load %arg15[%c0_38, %116, %c0_39] : memref<2x8x32xf32, #tpu.memory_space<vmem>>, vector<2x1x32xf32>
    tpu.vector_store %arg15[%c0_38, %116, %c0_39], %115 {strides = array<i32>} : memref<2x8x32xf32, #tpu.memory_space<vmem>>, vector<2x1x32xf32>,
    %c3_i32 = arith.constant 3 : i32
    %c0_40 = arith.constant 0 : index
    %118 = arith.index_cast %c3_i32 : i32 to index
    %c0_41 = arith.constant 0 : index
    %119 = vector.load %arg14[%c0_40, %118, %c0_41] : memref<2x8x96xf32, #tpu.memory_space<vmem>>, vector<2x1x96xf32>
    %120 = vector.shape_cast %119 : vector<2x1x96xf32> to vector<2x96xf32>
    %cst_42 = arith.constant dense<0.000000e+00> : vector<2x96xf32>
    %121 = tpu.matmul %114, %9, %cst_42 {dimension_numbers = #tpu.dot_dimension_numbers<[1], [0], [0], [1], [0, 0, 1, 1], [], []>} : vector<2x32xf32>, vector<32x96xf32>, vector<2x96xf32> -> vector<2x96xf32>
    %122 = vector.broadcast %10 : vector<1x96xf32> to vector<2x96xf32>
    %123 = arith.addf %121, %122 : vector<2x96xf32>
    %124 = vector.extract_strided_slice %120 {offsets = [0, 0], sizes = [2, 32], strides = [1, 1]} : vector<2x96xf32> to vector<2x32xf32>
    %125 = vector.extract_strided_slice %123 {offsets = [0, 0], sizes = [2, 32], strides = [1, 1]} : vector<2x96xf32> to vector<2x32xf32>
    %126 = arith.addf %124, %125 : vector<2x32xf32>
    %127 = arith.negf %126 : vector<2x32xf32>
    %128 = math.exp %127 : vector<2x32xf32>
    %cst_43 = arith.constant 1.000000e+00 : f32
    %129 = vector.broadcast %cst_43 : f32 to vector<2x32xf32>
    %130 = arith.addf %129, %128 : vector<2x32xf32>
    %131 = arith.divf %129, %130 : vector<2x32xf32>
    %132 = vector.extract_strided_slice %120 {offsets = [0, 32], sizes = [2, 32], strides = [1, 1]} : vector<2x96xf32> to vector<2x32xf32>
    %133 = vector.extract_strided_slice %123 {offsets = [0, 32], sizes = [2, 32], strides = [1, 1]} : vector<2x96xf32> to vector<2x32xf32>
    %134 = arith.addf %132, %133 : vector<2x32xf32>
    %135 = arith.negf %134 : vector<2x32xf32>
    %136 = math.exp %135 : vector<2x32xf32>
    %cst_44 = arith.constant 1.000000e+00 : f32
    %137 = vector.broadcast %cst_44 : f32 to vector<2x32xf32>
    %138 = arith.addf %137, %136 : vector<2x32xf32>
    %139 = arith.divf %137, %138 : vector<2x32xf32>
    %140 = vector.extract_strided_slice %120 {offsets = [0, 64], sizes = [2, 32], strides = [1, 1]} : vector<2x96xf32> to vector<2x32xf32>
    %141 = vector.extract_strided_slice %123 {offsets = [0, 64], sizes = [2, 32], strides = [1, 1]} : vector<2x96xf32> to vector<2x32xf32>
    %142 = arith.mulf %131, %141 : vector<2x32xf32>
    %143 = arith.addf %140, %142 : vector<2x32xf32>
    %144 = math.tanh %143 : vector<2x32xf32>
    %cst_45 = arith.constant 1.000000e+00 : f32
    %145 = vector.broadcast %cst_45 : f32 to vector<2x32xf32>
    %146 = arith.subf %145, %139 : vector<2x32xf32>
    %147 = arith.mulf %146, %144 : vector<2x32xf32>
    %148 = arith.mulf %139, %114 : vector<2x32xf32>
    %149 = arith.addf %147, %148 : vector<2x32xf32>
    %150 = vector.shape_cast %149 : vector<2x32xf32> to vector<2x1x32xf32>
    %c0_46 = arith.constant 0 : index
    %151 = arith.index_cast %c3_i32 : i32 to index
    %c0_47 = arith.constant 0 : index
    %152 = vector.load %arg15[%c0_46, %151, %c0_47] : memref<2x8x32xf32, #tpu.memory_space<vmem>>, vector<2x1x32xf32>
    tpu.vector_store %arg15[%c0_46, %151, %c0_47], %150 {strides = array<i32>} : memref<2x8x32xf32, #tpu.memory_space<vmem>>, vector<2x1x32xf32>,
    %c4_i32 = arith.constant 4 : i32
    %c0_48 = arith.constant 0 : index
    %153 = arith.index_cast %c4_i32 : i32 to index
    %c0_49 = arith.constant 0 : index
    %154 = vector.load %arg14[%c0_48, %153, %c0_49] : memref<2x8x96xf32, #tpu.memory_space<vmem>>, vector<2x1x96xf32>
    %155 = vector.shape_cast %154 : vector<2x1x96xf32> to vector<2x96xf32>
    %cst_50 = arith.constant dense<0.000000e+00> : vector<2x96xf32>
    %156 = tpu.matmul %149, %9, %cst_50 {dimension_numbers = #tpu.dot_dimension_numbers<[1], [0], [0], [1], [0, 0, 1, 1], [], []>} : vector<2x32xf32>, vector<32x96xf32>, vector<2x96xf32> -> vector<2x96xf32>
    %157 = vector.broadcast %10 : vector<1x96xf32> to vector<2x96xf32>
    %158 = arith.addf %156, %157 : vector<2x96xf32>
    %159 = vector.extract_strided_slice %155 {offsets = [0, 0], sizes = [2, 32], strides = [1, 1]} : vector<2x96xf32> to vector<2x32xf32>
    %160 = vector.extract_strided_slice %158 {offsets = [0, 0], sizes = [2, 32], strides = [1, 1]} : vector<2x96xf32> to vector<2x32xf32>
    %161 = arith.addf %159, %160 : vector<2x32xf32>
    %162 = arith.negf %161 : vector<2x32xf32>
    %163 = math.exp %162 : vector<2x32xf32>
    %cst_51 = arith.constant 1.000000e+00 : f32
    %164 = vector.broadcast %cst_51 : f32 to vector<2x32xf32>
    %165 = arith.addf %164, %163 : vector<2x32xf32>
    %166 = arith.divf %164, %165 : vector<2x32xf32>
    %167 = vector.extract_strided_slice %155 {offsets = [0, 32], sizes = [2, 32], strides = [1, 1]} : vector<2x96xf32> to vector<2x32xf32>
    %168 = vector.extract_strided_slice %158 {offsets = [0, 32], sizes = [2, 32], strides = [1, 1]} : vector<2x96xf32> to vector<2x32xf32>
    %169 = arith.addf %167, %168 : vector<2x32xf32>
    %170 = arith.negf %169 : vector<2x32xf32>
    %171 = math.exp %170 : vector<2x32xf32>
    %cst_52 = arith.constant 1.000000e+00 : f32
    %172 = vector.broadcast %cst_52 : f32 to vector<2x32xf32>
    %173 = arith.addf %172, %171 : vector<2x32xf32>
    %174 = arith.divf %172, %173 : vector<2x32xf32>
    %175 = vector.extract_strided_slice %155 {offsets = [0, 64], sizes = [2, 32], strides = [1, 1]} : vector<2x96xf32> to vector<2x32xf32>
    %176 = vector.extract_strided_slice %158 {offsets = [0, 64], sizes = [2, 32], strides = [1, 1]} : vector<2x96xf32> to vector<2x32xf32>
    %177 = arith.mulf %166, %176 : vector<2x32xf32>
    %178 = arith.addf %175, %177 : vector<2x32xf32>
    %179 = math.tanh %178 : vector<2x32xf32>
    %cst_53 = arith.constant 1.000000e+00 : f32
    %180 = vector.broadcast %cst_53 : f32 to vector<2x32xf32>
    %181 = arith.subf %180, %174 : vector<2x32xf32>
    %182 = arith.mulf %181, %179 : vector<2x32xf32>
    %183 = arith.mulf %174, %149 : vector<2x32xf32>
    %184 = arith.addf %182, %183 : vector<2x32xf32>
    %185 = vector.shape_cast %184 : vector<2x32xf32> to vector<2x1x32xf32>
    %c0_54 = arith.constant 0 : index
    %186 = arith.index_cast %c4_i32 : i32 to index
    %c0_55 = arith.constant 0 : index
    %187 = vector.load %arg15[%c0_54, %186, %c0_55] : memref<2x8x32xf32, #tpu.memory_space<vmem>>, vector<2x1x32xf32>
    tpu.vector_store %arg15[%c0_54, %186, %c0_55], %185 {strides = array<i32>} : memref<2x8x32xf32, #tpu.memory_space<vmem>>, vector<2x1x32xf32>,
    %c5_i32 = arith.constant 5 : i32
    %c0_56 = arith.constant 0 : index
    %188 = arith.index_cast %c5_i32 : i32 to index
    %c0_57 = arith.constant 0 : index
    %189 = vector.load %arg14[%c0_56, %188, %c0_57] : memref<2x8x96xf32, #tpu.memory_space<vmem>>, vector<2x1x96xf32>
    %190 = vector.shape_cast %189 : vector<2x1x96xf32> to vector<2x96xf32>
    %cst_58 = arith.constant dense<0.000000e+00> : vector<2x96xf32>
    %191 = tpu.matmul %184, %9, %cst_58 {dimension_numbers = #tpu.dot_dimension_numbers<[1], [0], [0], [1], [0, 0, 1, 1], [], []>} : vector<2x32xf32>, vector<32x96xf32>, vector<2x96xf32> -> vector<2x96xf32>
    %192 = vector.broadcast %10 : vector<1x96xf32> to vector<2x96xf32>
    %193 = arith.addf %191, %192 : vector<2x96xf32>
    %194 = vector.extract_strided_slice %190 {offsets = [0, 0], sizes = [2, 32], strides = [1, 1]} : vector<2x96xf32> to vector<2x32xf32>
    %195 = vector.extract_strided_slice %193 {offsets = [0, 0], sizes = [2, 32], strides = [1, 1]} : vector<2x96xf32> to vector<2x32xf32>
    %196 = arith.addf %194, %195 : vector<2x32xf32>
    %197 = arith.negf %196 : vector<2x32xf32>
    %198 = math.exp %197 : vector<2x32xf32>
    %cst_59 = arith.constant 1.000000e+00 : f32
    %199 = vector.broadcast %cst_59 : f32 to vector<2x32xf32>
    %200 = arith.addf %199, %198 : vector<2x32xf32>
    %201 = arith.divf %199, %200 : vector<2x32xf32>
    %202 = vector.extract_strided_slice %190 {offsets = [0, 32], sizes = [2, 32], strides = [1, 1]} : vector<2x96xf32> to vector<2x32xf32>
    %203 = vector.extract_strided_slice %193 {offsets = [0, 32], sizes = [2, 32], strides = [1, 1]} : vector<2x96xf32> to vector<2x32xf32>
    %204 = arith.addf %202, %203 : vector<2x32xf32>
    %205 = arith.negf %204 : vector<2x32xf32>
    %206 = math.exp %205 : vector<2x32xf32>
    %cst_60 = arith.constant 1.000000e+00 : f32
    %207 = vector.broadcast %cst_60 : f32 to vector<2x32xf32>
    %208 = arith.addf %207, %206 : vector<2x32xf32>
    %209 = arith.divf %207, %208 : vector<2x32xf32>
    %210 = vector.extract_strided_slice %190 {offsets = [0, 64], sizes = [2, 32], strides = [1, 1]} : vector<2x96xf32> to vector<2x32xf32>
    %211 = vector.extract_strided_slice %193 {offsets = [0, 64], sizes = [2, 32], strides = [1, 1]} : vector<2x96xf32> to vector<2x32xf32>
    %212 = arith.mulf %201, %211 : vector<2x32xf32>
    %213 = arith.addf %210, %212 : vector<2x32xf32>
    %214 = math.tanh %213 : vector<2x32xf32>
    %cst_61 = arith.constant 1.000000e+00 : f32
    %215 = vector.broadcast %cst_61 : f32 to vector<2x32xf32>
    %216 = arith.subf %215, %209 : vector<2x32xf32>
    %217 = arith.mulf %216, %214 : vector<2x32xf32>
    %218 = arith.mulf %209, %184 : vector<2x32xf32>
    %219 = arith.addf %217, %218 : vector<2x32xf32>
    %220 = vector.shape_cast %219 : vector<2x32xf32> to vector<2x1x32xf32>
    %c0_62 = arith.constant 0 : index
    %221 = arith.index_cast %c5_i32 : i32 to index
    %c0_63 = arith.constant 0 : index
    %222 = vector.load %arg15[%c0_62, %221, %c0_63] : memref<2x8x32xf32, #tpu.memory_space<vmem>>, vector<2x1x32xf32>
    tpu.vector_store %arg15[%c0_62, %221, %c0_63], %220 {strides = array<i32>} : memref<2x8x32xf32, #tpu.memory_space<vmem>>, vector<2x1x32xf32>,
    %c6_i32 = arith.constant 6 : i32
    %c0_64 = arith.constant 0 : index
    %223 = arith.index_cast %c6_i32 : i32 to index
    %c0_65 = arith.constant 0 : index
    %224 = vector.load %arg14[%c0_64, %223, %c0_65] : memref<2x8x96xf32, #tpu.memory_space<vmem>>, vector<2x1x96xf32>
    %225 = vector.shape_cast %224 : vector<2x1x96xf32> to vector<2x96xf32>
    %cst_66 = arith.constant dense<0.000000e+00> : vector<2x96xf32>
    %226 = tpu.matmul %219, %9, %cst_66 {dimension_numbers = #tpu.dot_dimension_numbers<[1], [0], [0], [1], [0, 0, 1, 1], [], []>} : vector<2x32xf32>, vector<32x96xf32>, vector<2x96xf32> -> vector<2x96xf32>
    %227 = vector.broadcast %10 : vector<1x96xf32> to vector<2x96xf32>
    %228 = arith.addf %226, %227 : vector<2x96xf32>
    %229 = vector.extract_strided_slice %225 {offsets = [0, 0], sizes = [2, 32], strides = [1, 1]} : vector<2x96xf32> to vector<2x32xf32>
    %230 = vector.extract_strided_slice %228 {offsets = [0, 0], sizes = [2, 32], strides = [1, 1]} : vector<2x96xf32> to vector<2x32xf32>
    %231 = arith.addf %229, %230 : vector<2x32xf32>
    %232 = arith.negf %231 : vector<2x32xf32>
    %233 = math.exp %232 : vector<2x32xf32>
    %cst_67 = arith.constant 1.000000e+00 : f32
    %234 = vector.broadcast %cst_67 : f32 to vector<2x32xf32>
    %235 = arith.addf %234, %233 : vector<2x32xf32>
    %236 = arith.divf %234, %235 : vector<2x32xf32>
    %237 = vector.extract_strided_slice %225 {offsets = [0, 32], sizes = [2, 32], strides = [1, 1]} : vector<2x96xf32> to vector<2x32xf32>
    %238 = vector.extract_strided_slice %228 {offsets = [0, 32], sizes = [2, 32], strides = [1, 1]} : vector<2x96xf32> to vector<2x32xf32>
    %239 = arith.addf %237, %238 : vector<2x32xf32>
    %240 = arith.negf %239 : vector<2x32xf32>
    %241 = math.exp %240 : vector<2x32xf32>
    %cst_68 = arith.constant 1.000000e+00 : f32
    %242 = vector.broadcast %cst_68 : f32 to vector<2x32xf32>
    %243 = arith.addf %242, %241 : vector<2x32xf32>
    %244 = arith.divf %242, %243 : vector<2x32xf32>
    %245 = vector.extract_strided_slice %225 {offsets = [0, 64], sizes = [2, 32], strides = [1, 1]} : vector<2x96xf32> to vector<2x32xf32>
    %246 = vector.extract_strided_slice %228 {offsets = [0, 64], sizes = [2, 32], strides = [1, 1]} : vector<2x96xf32> to vector<2x32xf32>
    %247 = arith.mulf %236, %246 : vector<2x32xf32>
    %248 = arith.addf %245, %247 : vector<2x32xf32>
    %249 = math.tanh %248 : vector<2x32xf32>
    %cst_69 = arith.constant 1.000000e+00 : f32
    %250 = vector.broadcast %cst_69 : f32 to vector<2x32xf32>
    %251 = arith.subf %250, %244 : vector<2x32xf32>
    %252 = arith.mulf %251, %249 : vector<2x32xf32>
    %253 = arith.mulf %244, %219 : vector<2x32xf32>
    %254 = arith.addf %252, %253 : vector<2x32xf32>
    %255 = vector.shape_cast %254 : vector<2x32xf32> to vector<2x1x32xf32>
    %c0_70 = arith.constant 0 : index
    %256 = arith.index_cast %c6_i32 : i32 to index
    %c0_71 = arith.constant 0 : index
    %257 = vector.load %arg15[%c0_70, %256, %c0_71] : memref<2x8x32xf32, #tpu.memory_space<vmem>>, vector<2x1x32xf32>
    tpu.vector_store %arg15[%c0_70, %256, %c0_71], %255 {strides = array<i32>} : memref<2x8x32xf32, #tpu.memory_space<vmem>>, vector<2x1x32xf32>,
    %c7_i32 = arith.constant 7 : i32
    %c0_72 = arith.constant 0 : index
    %258 = arith.index_cast %c7_i32 : i32 to index
    %c0_73 = arith.constant 0 : index
    %259 = vector.load %arg14[%c0_72, %258, %c0_73] : memref<2x8x96xf32, #tpu.memory_space<vmem>>, vector<2x1x96xf32>
    %260 = vector.shape_cast %259 : vector<2x1x96xf32> to vector<2x96xf32>
    %cst_74 = arith.constant dense<0.000000e+00> : vector<2x96xf32>
    %261 = tpu.matmul %254, %9, %cst_74 {dimension_numbers = #tpu.dot_dimension_numbers<[1], [0], [0], [1], [0, 0, 1, 1], [], []>} : vector<2x32xf32>, vector<32x96xf32>, vector<2x96xf32> -> vector<2x96xf32>
    %262 = vector.broadcast %10 : vector<1x96xf32> to vector<2x96xf32>
    %263 = arith.addf %261, %262 : vector<2x96xf32>
    %264 = vector.extract_strided_slice %260 {offsets = [0, 0], sizes = [2, 32], strides = [1, 1]} : vector<2x96xf32> to vector<2x32xf32>
    %265 = vector.extract_strided_slice %263 {offsets = [0, 0], sizes = [2, 32], strides = [1, 1]} : vector<2x96xf32> to vector<2x32xf32>
    %266 = arith.addf %264, %265 : vector<2x32xf32>
    %267 = arith.negf %266 : vector<2x32xf32>
    %268 = math.exp %267 : vector<2x32xf32>
    %cst_75 = arith.constant 1.000000e+00 : f32
    %269 = vector.broadcast %cst_75 : f32 to vector<2x32xf32>
    %270 = arith.addf %269, %268 : vector<2x32xf32>
    %271 = arith.divf %269, %270 : vector<2x32xf32>
    %272 = vector.extract_strided_slice %260 {offsets = [0, 32], sizes = [2, 32], strides = [1, 1]} : vector<2x96xf32> to vector<2x32xf32>
    %273 = vector.extract_strided_slice %263 {offsets = [0, 32], sizes = [2, 32], strides = [1, 1]} : vector<2x96xf32> to vector<2x32xf32>
    %274 = arith.addf %272, %273 : vector<2x32xf32>
    %275 = arith.negf %274 : vector<2x32xf32>
    %276 = math.exp %275 : vector<2x32xf32>
    %cst_76 = arith.constant 1.000000e+00 : f32
    %277 = vector.broadcast %cst_76 : f32 to vector<2x32xf32>
    %278 = arith.addf %277, %276 : vector<2x32xf32>
    %279 = arith.divf %277, %278 : vector<2x32xf32>
    %280 = vector.extract_strided_slice %260 {offsets = [0, 64], sizes = [2, 32], strides = [1, 1]} : vector<2x96xf32> to vector<2x32xf32>
    %281 = vector.extract_strided_slice %263 {offsets = [0, 64], sizes = [2, 32], strides = [1, 1]} : vector<2x96xf32> to vector<2x32xf32>
    %282 = arith.mulf %271, %281 : vector<2x32xf32>
    %283 = arith.addf %280, %282 : vector<2x32xf32>
    %284 = math.tanh %283 : vector<2x32xf32>
    %cst_77 = arith.constant 1.000000e+00 : f32
    %285 = vector.broadcast %cst_77 : f32 to vector<2x32xf32>
    %286 = arith.subf %285, %279 : vector<2x32xf32>
    %287 = arith.mulf %286, %284 : vector<2x32xf32>
    %288 = arith.mulf %279, %254 : vector<2x32xf32>
    %289 = arith.addf %287, %288 : vector<2x32xf32>
    %290 = vector.shape_cast %289 : vector<2x32xf32> to vector<2x1x32xf32>
    %c0_78 = arith.constant 0 : index
    %291 = arith.index_cast %c7_i32 : i32 to index
    %c0_79 = arith.constant 0 : index
    %292 = vector.load %arg15[%c0_78, %291, %c0_79] : memref<2x8x32xf32, #tpu.memory_space<vmem>>, vector<2x1x32xf32>
    tpu.vector_store %arg15[%c0_78, %291, %c0_79], %290 {strides = array<i32>} : memref<2x8x32xf32, #tpu.memory_space<vmem>>, vector<2x1x32xf32>,
    %c8_i32 = arith.constant 8 : i32
    %293 = vector.shape_cast %289 : vector<2x32xf32> to vector<2x1x32xf32>
    %c0_80 = arith.constant 0 : index
    %c0_81 = arith.constant 0 : index
    %c0_82 = arith.constant 0 : index
    %294 = vector.load %arg12[%c0_80, %c0_81, %c0_82] : memref<2x1x32xf32, #tpu.memory_space<vmem>>, vector<2x1x32xf32>
    tpu.vector_store %arg12[%c0_80, %c0_81, %c0_82], %293 {strides = array<i32>} : memref<2x1x32xf32, #tpu.memory_space<vmem>>, vector<2x1x32xf32>,
    %c0_83 = arith.constant 0 : index
    %c0_84 = arith.constant 0 : index
    %c0_85 = arith.constant 0 : index
    %295 = vector.load %arg15[%c0_83, %c0_84, %c0_85] : memref<2x8x32xf32, #tpu.memory_space<vmem>>, vector<2x8x32xf32>
    %c0_86 = arith.constant 0 : index
    %c0_87 = arith.constant 0 : index
    %c0_88 = arith.constant 0 : index
    %296 = vector.load %arg2[%c0_86, %c0_87, %c0_88] : memref<2x16x32xf32, #tpu.memory_space<vmem>>, vector<2x16x32xf32>
    "tpu.trace_start"() <{level = 10 : i32, message = "bth,bsh->bts"}> : () -> ()
    %cst_89 = arith.constant dense<0.000000e+00> : vector<2x8x16xf32>
    %297 = tpu.matmul %295, %296, %cst_89 {dimension_numbers = #tpu.dot_dimension_numbers<[2], [2], [1], [1], [0, 0, 0, 1, 1, 1], [0], [0]>} : vector<2x8x32xf32>, vector<2x16x32xf32>, vector<2x8x16xf32> -> vector<2x8x16xf32>
    "tpu.trace_stop"() : () -> ()
    %cst_90 = arith.constant dense<0xFF800000> : vector<2x8xf32>
    %298 = vector.multi_reduction <maximumf>, %297, %cst_90 [2] : vector<2x8x16xf32> to vector<2x8xf32>
    %299 = vector.shape_cast %298 : vector<2x8xf32> to vector<2x8x1xf32>
    %300 = vector.broadcast %299 : vector<2x8x1xf32> to vector<2x8x16xf32>
    %301 = arith.subf %297, %300 : vector<2x8x16xf32>
    %302 = math.exp %301 : vector<2x8x16xf32>
    %cst_91 = arith.constant dense<0.000000e+00> : vector<2x8xf32>
    %303 = vector.multi_reduction <add>, %302, %cst_91 [2] : vector<2x8x16xf32> to vector<2x8xf32>
    %304 = vector.shape_cast %303 : vector<2x8xf32> to vector<2x8x1xf32>
    %305 = tpu.reciprocal %304 {approx = true} : vector<2x8x1xf32> -> vector<2x8x1xf32>
    %306 = vector.broadcast %305 : vector<2x8x1xf32> to vector<2x8x16xf32>
    %307 = arith.mulf %302, %306 : vector<2x8x16xf32>
    %c0_92 = arith.constant 0 : index
    %c0_93 = arith.constant 0 : index
    %c0_94 = arith.constant 0 : index
    %308 = vector.load %arg13[%c0_92, %c0_93, %c0_94] : memref<2x8x16xf32, #tpu.memory_space<vmem>>, vector<2x8x16xf32>
    tpu.vector_store %arg13[%c0_92, %c0_93, %c0_94], %307 {strides = array<i32>} : memref<2x8x16xf32, #tpu.memory_space<vmem>>, vector<2x8x16xf32>,
    "tpu.trace_start"() <{level = 10 : i32, message = "bts,bsh->bth"}> : () -> ()
    %cst_95 = arith.constant dense<0.000000e+00> : vector<2x8x32xf32>
    %309 = tpu.matmul %307, %296, %cst_95 {dimension_numbers = #tpu.dot_dimension_numbers<[2], [1], [1], [2], [0, 0, 0, 1, 1, 2], [0], [0]>} : vector<2x8x16xf32>, vector<2x16x32xf32>, vector<2x8x32xf32> -> vector<2x8x32xf32>
    "tpu.trace_stop"() : () -> ()
    %310 = vector.shape_cast %295 : vector<2x8x32xf32> to vector<16x32xf32>
    %311 = vector.shape_cast %309 : vector<2x8x32xf32> to vector<16x32xf32>
    %c0_96 = arith.constant 0 : index
    %c0_97 = arith.constant 0 : index
    %312 = vector.load %arg8[%c0_96, %c0_97] : memref<32x16xf32, #tpu.memory_space<vmem>>, vector<32x16xf32>
    %cst_98 = arith.constant dense<0.000000e+00> : vector<16x16xf32>
    %313 = tpu.matmul %310, %312, %cst_98 {dimension_numbers = #tpu.dot_dimension_numbers<[1], [0], [0], [1], [0, 0, 1, 1], [], []>} : vector<16x32xf32>, vector<32x16xf32>, vector<16x16xf32> -> vector<16x16xf32>
    %c0_99 = arith.constant 0 : index
    %c0_100 = arith.constant 0 : index
    %314 = vector.load %arg9[%c0_99, %c0_100] : memref<32x16xf32, #tpu.memory_space<vmem>>, vector<32x16xf32>
    %cst_101 = arith.constant dense<0.000000e+00> : vector<16x16xf32>
    %315 = tpu.matmul %311, %314, %cst_101 {dimension_numbers = #tpu.dot_dimension_numbers<[1], [0], [0], [1], [0, 0, 1, 1], [], []>} : vector<16x32xf32>, vector<32x16xf32>, vector<16x16xf32> -> vector<16x16xf32>
    %316 = arith.addf %313, %315 : vector<16x16xf32>
    %c0_102 = arith.constant 0 : index
    %c0_103 = arith.constant 0 : index
    %317 = vector.load %arg10[%c0_102, %c0_103] : memref<1x16xf32, #tpu.memory_space<vmem>>, vector<1x16xf32>
    %318 = vector.broadcast %317 : vector<1x16xf32> to vector<16x16xf32>
    %319 = arith.addf %316, %318 : vector<16x16xf32>
    %320 = vector.shape_cast %319 : vector<16x16xf32> to vector<2x8x16xf32>
    %c0_104 = arith.constant 0 : index
    %c0_105 = arith.constant 0 : index
    %c0_106 = arith.constant 0 : index
    %321 = vector.load %arg11[%c0_104, %c0_105, %c0_106] : memref<2x8x16xf32, #tpu.memory_space<vmem>>, vector<2x8x16xf32>
    tpu.vector_store %arg11[%c0_104, %c0_105, %c0_106], %320 {strides = array<i32>} : memref<2x8x16xf32, #tpu.memory_space<vmem>>, vector<2x8x16xf32>,
    return
  }
  func.func @transform_0(%arg0: i32) -> (i32, i32, i32) {
    %c0_i32 = arith.constant 0 : i32
    %c0_i32_0 = arith.constant 0 : i32
    %c0_i32_1 = arith.constant 0 : i32
    return %arg0, %c0_i32, %c0_i32_0 : i32, i32, i32
  }
  func.func @transform_1(%arg0: i32) -> (i32, i32, i32) {
    %c0_i32 = arith.constant 0 : i32
    %c0_i32_0 = arith.constant 0 : i32
    %c0_i32_1 = arith.constant 0 : i32
    return %arg0, %c0_i32, %c0_i32_0 : i32, i32, i32
  }
  func.func @transform_2(%arg0: i32) -> (i32, i32, i32) {
    %c0_i32 = arith.constant 0 : i32
    %c0_i32_0 = arith.constant 0 : i32
    %c0_i32_1 = arith.constant 0 : i32
    return %arg0, %c0_i32, %c0_i32_0 : i32, i32, i32
  }
  func.func @transform_3(%arg0: i32) -> (i32, i32) {
    %c0_i32 = arith.constant 0 : i32
    %c0_i32_0 = arith.constant 0 : i32
    %c0_i32_1 = arith.constant 0 : i32
    return %c0_i32, %c0_i32_0 : i32, i32
  }
  func.func @transform_4(%arg0: i32) -> (i32, i32) {
    %c0_i32 = arith.constant 0 : i32
    %c0_i32_0 = arith.constant 0 : i32
    %c0_i32_1 = arith.constant 0 : i32
    return %c0_i32, %c0_i32_0 : i32, i32
  }
  func.func @transform_5(%arg0: i32) -> (i32, i32) {
    %c0_i32 = arith.constant 0 : i32
    %c0_i32_0 = arith.constant 0 : i32
    %c0_i32_1 = arith.constant 0 : i32
    return %c0_i32, %c0_i32_0 : i32, i32
  }
  func.func @transform_6(%arg0: i32) -> (i32, i32) {
    %c0_i32 = arith.constant 0 : i32
    %c0_i32_0 = arith.constant 0 : i32
    %c0_i32_1 = arith.constant 0 : i32
    return %c0_i32, %c0_i32_0 : i32, i32
  }
  func.func @transform_7(%arg0: i32) -> (i32, i32) {
    %c0_i32 = arith.constant 0 : i32
    %c0_i32_0 = arith.constant 0 : i32
    %c0_i32_1 = arith.constant 0 : i32
    return %c0_i32, %c0_i32_0 : i32, i32
  }
  func.func @transform_8(%arg0: i32) -> (i32, i32) {
    %c0_i32 = arith.constant 0 : i32
    %c0_i32_0 = arith.constant 0 : i32
    %c0_i32_1 = arith.constant 0 : i32
    return %c0_i32, %c0_i32_0 : i32, i32
  }
  func.func @transform_9(%arg0: i32) -> (i32, i32) {
    %c0_i32 = arith.constant 0 : i32
    %c0_i32_0 = arith.constant 0 : i32
    %c0_i32_1 = arith.constant 0 : i32
    return %c0_i32, %c0_i32_0 : i32, i32
  }
  func.func @transform_10(%arg0: i32) -> (i32, i32, i32) {
    %c0_i32 = arith.constant 0 : i32
    %c0_i32_0 = arith.constant 0 : i32
    %c0_i32_1 = arith.constant 0 : i32
    return %arg0, %c0_i32, %c0_i32_0 : i32, i32, i32
  }
  func.func @transform_11(%arg0: i32) -> (i32, i32, i32) {
    %c0_i32 = arith.constant 0 : i32
    %c0_i32_0 = arith.constant 0 : i32
    %c0_i32_1 = arith.constant 0 : i32
    return %arg0, %c0_i32, %c0_i32_0 : i32, i32, i32
  }
  func.func @transform_12(%arg0: i32) -> (i32, i32, i32) {
    %c0_i32 = arith.constant 0 : i32
    %c0_i32_0 = arith.constant 0 : i32
    %c0_i32_1 = arith.constant 0 : i32
    return %arg0, %c0_i32, %c0_i32_0 : i32, i32, i32
  }
}

</mosaic_0001>

<bundles_post_ra>
// kernel: attention_decoder_forward.1
= control target key start
LH: loop header
LB: loop body
LE: loop exit
PB: predicated region body
PF: predicated region fallthrough
CT: control target
= control target key end

     0   :  { %18 = vsyncpa [#allocation5], 0  ;;  %v159_v3 = vlaneseq  ;;  %v2316_v4 = vmov 0.0   ;;  %v2317_v7 = vmov 1966171168   ;;  %vm53_vm0 = vcmask 261120   ;;  %s2814_s0 = inlined_call_operand.vmem [shape: f32[2,8,32], index: 0, kind: input, shape index: {}]   ;;  %s2815_s1 = inlined_call_operand.vmem [shape: f32[2,16,32], index: 1, kind: input, shape index: {}]   ;;  %s2816_s2 = inlined_call_operand.vmem [shape: f32[2,1,32], index: 2, kind: input, shape index: {}]   ;;  %s2817_s3 = inlined_call_operand.vmem [shape: f32[32,96], index: 3, kind: input, shape index: {}]   ;;  %s2818_s4 = inlined_call_operand.vmem [shape: f32[32,96], index: 4, kind: input, shape index: {}]   ;;  %s2819_s5 = inlined_call_operand.vmem [shape: f32[1,96], index: 5, kind: input, shape index: {}]   ;;  %s2820_s6 = inlined_call_operand.vmem [shape: f32[1,96], index: 6, kind: input, shape index: {}]   ;;  %s2821_s7 = inlined_call_operand.vmem [shape: f32[32,16], index: 7, kind: input, shape index: {}]   ;;  %s2822_s8 = inlined_call_operand.vmem [shape: f32[32,16], index: 8, kind: input, shape index: {}]   ;;  %s2823_s9 = inlined_call_operand.vmem [shape: f32[1,16], index: 9, kind: input, shape index: {}]   ;;  %s2824_s10 = inlined_call_operand.hbm [shape: f32[2,8,16], index: 10, kind: output, shape index: {0}]   ;;  %s2825_s11 = inlined_call_operand.hbm [shape: f32[2,1,32], index: 11, kind: output, shape index: {1}]   ;;  %s2826_s12 = inlined_call_operand.hbm [shape: f32[2,8,16], index: 12, kind: output, shape index: {2}]  }
   0x1   :  { %v45_v0 = vld [vmem:[%s2817_s3 + $0x18] sm:$0xff]  ;;  %v44_v1 = vld [vmem:[%s2817_s3 + $0x10] sm:$0xff]  ;;  %1997 = vmatprep.subr.mxu1 %v2316_v4  ;;  %v43_v6 = vld [vmem:[%s2817_s3 + $0x8] sm:$0xff]  ;;  %v157_v8 = vunpack.c.l.s4 %v2317_v7 }
   0x2   :  { %v2403_v2 = vld [vmem:[%s2818_s4 + $0x18] sm:$0xff]  ;;  %1986 = vmatprep.subr.mxu0 %v45_v0  ;;  %v2409_v5 = vld [vmem:[%s2818_s4 + $0x10] sm:$0xff]  ;;  %v2415_v9 = vshrl.u32 %v159_v3, 7  ;;  %v40_v10 = vld [vmem:[%s2814_s0] sm:$0xff] }
   0x3   :  { %1987 = vmatpush3.msra.mxu0 %v45_v0  ;;  %1998 = vmatpush3.msra.mxu1 %v2403_v2  ;;  %v2424_v11 = vld [vmem:[%s2816_s2] sm:$0x1]  ;;  %v2429_v12 = vld [vmem:[%s2816_s2 + $0x1] sm:$0x1]  ;;  %v2438_v14 = vld [vmem:[%s2818_s4 + $0x8] sm:$0xff]  ;;  %v158_v16 = vunpack.c.0.s8 %v157_v8 }
   0x4   :  { %1988 = vmatprep.subr.mxu0 %v44_v1  ;;  %1999 = vmatprep.subr.mxu1 %v2316_v4  ;;  %v42_v13 = vld [vmem:[%s2817_s3] sm:$0xff]  ;;  %v155_v15 = vcombine.low %v2424_v11, %v2429_v12 }
   0x5   :  { %1989 = vmatpush3.msra.mxu0 %v44_v1  ;;  %2000 = vmatpush3.msra.mxu1 %v2409_v5 }
   0x6   :  { %19 = vsyncpa [#allocation7], 0  ;;  %1990 = vmatprep.subr.mxu0 %v43_v6  ;;  %2001 = vmatprep.subr.mxu1 %v2316_v4  ;;  %v41_v17 = vld [vmem:[%s2814_s0 + $0x8] sm:$0xff]  ;;  %v2450_v18 = vld [vmem:[%s2818_s4] sm:$0xff]  ;;  %v161_v19 = vsub.s32 %v158_v16, %v2415_v9  ;;  %vm2318_vm1 = vmmov 0   ;;  %vm135_vm2 = vcmask 785408  }
   0x7   :  { %1991 = vmatpush3.msra.mxu0 %v43_v6  ;;  %1994 = vmatprep.mubr.msk.f32.mxu0 %vm53_vm0, %v40_v10  ;;  %v1875_v22 = vld [vmem:[%s2819_s5] ss:$0 sm:$0xff]  ;;  %s2319_s27 = smov 64   ;;  %v294_v45 = vsub.s32 0, %v2415_v9  ;;  %s2320_s5 = smov 32   ;;  %vm324_vm3 = vcmask 1041409  }
   0x8   :  { %1992 = vmatprep.subr.mxu0 %v42_v13  ;;  %2002 = vmatpush3.msra.mxu1 %v2438_v14  ;;  %v162_v20 = vrot.slane %v155_v15, %v161_v19  ;;  %v2488_v25 = vld [vmem:[%s2820_s6] ss:$0 sm:$0xff]  ;;  %s2321_s6 = smov 96   ;;  %vm318_vm4 = vcmask 253952   ;;  %vm1482_vm5 = vcmask 130048  }
   0x9   :  { %1993 = vmatpush3.msra.mxu0 %v42_v13  ;;  %2003 = vmatprep.subr.mxu1 %v2316_v4  ;;  %v299_v49 = vrot.slane %v2429_v12, %v294_v45  ;;  %v295_v50 = vrot.slane %v2424_v11, %v294_v45 }
   0xa   :  { %1995 = vmatmul.mubr.msk.f32.vlgmr.msra.gmra.mxu0 %vm53_vm0, %v41_v17  ;;  %2004 = vmatpush3.msra.mxu1 %v2450_v18  ;;  %v169_v21 = vrot.slane %v162_v20, %v161_v19 }
   0xb   :  { %2005 = vmatprep.mubr.msk.f32.mxu1 %vm2318_vm1, %v2316_v4  ;;  %2008 = vmatprep.subr.mxu0 %v2316_v4 }
   0xc   :  { %2009 = vmatpush3.msra.mxu0 %v2403_v2  ;;  %2016 = vmatprep.mubr.msk.f32.mxu0 %vm2318_vm1, %v2316_v4 }
   0xd   :  { %2006 = vmatmul.mubr.msk.f32.vlgmr.msra.gmra.mxu1 %vm53_vm0, %v169_v21  ;;  %2010 = vmatprep.subr.mxu0 %v2316_v4 }
   0xe   :  { %2011 = vmatpush3.msra.mxu0 %v2409_v5  ;;  %2019 = vmatprep.subr.mxu1 %v2316_v4 }
   0xf   :  { %2012 = vmatprep.subr.mxu0 %v2316_v4  ;;  %2020 = vmatpush3.msra.mxu1 %v2403_v2 }
  0x10   :  { %2013 = vmatpush3.msra.mxu0 %v2438_v14  ;;  %2021 = vmatprep.subr.mxu1 %v2316_v4 }
  0x11   :  { %2014 = vmatprep.subr.mxu0 %v2316_v4  ;;  %2022 = vmatpush3.msra.mxu1 %v2409_v5 }
  0x12   :  { %2015 = vmatpush3.msra.mxu0 %v2450_v18  ;;  %2023 = vmatprep.subr.mxu1 %v2316_v4 }
  0x13   :  { %2024 = vmatpush3.msra.mxu1 %v2438_v14  ;;  %2027 = vmatprep.mubr.msk.f32.mxu1 %vm2318_vm1, %v2316_v4 }
  0x14   :  { %2025 = vmatprep.subr.mxu1 %v2316_v4  ;;  %2030 = vmatprep.subr.mxu0 %v2316_v4 }
  0x15   :  { %2026 = vmatpush3.msra.mxu1 %v2450_v18 }
  0x16   :  { %2041 = vmatprep.subr.mxu1 %v2316_v4 }
  0xca   :  { %v1996_v23 = vpop.f32.mrf.mxu0 }
  0xcb   :  { %v132_v24 = vadd.f32 %v1996_v23, %v1875_v22 }
  0xcc   :  { %v126_v26 = vpop.f32.mrf.mxu0 }
  0xcd   :  { %137 = vst.msk [vmem:[#allocation2 + $0x8] sm:$0xff] %vm135_vm2, %v132_v24  ;;  %v127_v27 = vadd.f32 %v1875_v22, %v126_v26  ;;  %v238_v28 = vpop.f32.mrf.mxu1 }
  0xce   :  { %v239_v29 = vadd.f32 %v2488_v25, %v238_v28 }
  0xcf   :  { %136 = vst.msk [vmem:[#allocation2] sm:$0xff] %vm135_vm2, %v127_v27  ;;  %v2007_v30 = vpop.f32.mrf.mxu1 }
  0xd0   :  { %v243_v31 = vrot.slane %v239_v29, 1 }
  0xd2   :  { %262 = vrot.lane.b32.xlu0 %v243_v31, %s2319_s27 }
  0xd4   :  { %v146_v32 = vld [vmem:[#allocation2 + $0x8] sm:$0x1]  ;;  %v322_v19 = vld [vmem:[#allocation2 + $0x9] sm:$0x1] }
  0xd5   :  { %v247_v33 = vadd.f32 %v243_v31, %v146_v32 }
  0xd6   :  { %260 = vrot.lane.b32.xlu0 %v239_v29, %s2319_s27  ;;  %v145_v34 = vld [vmem:[#allocation2] sm:$0x1]  ;;  %v321_v16 = vld [vmem:[#allocation2 + $0x1] sm:$0x1] }
  0xd7   :  { %v246_v35 = vadd.f32 %v239_v29, %v145_v34  ;;  %v1881_v36 = vmul.f32 -1.442695, %v247_v33 }
  0xd9   :  { %v1880_v37 = vmul.f32 -1.442695, %v246_v35  ;;  %2148 = vpow2.f32 %v1881_v36 }
  0xdb   :  { %2150 = vpow2.f32 %v1880_v37 }
  0xe6   :  { %v2149_v38 = vpop.eup %2148 }
  0xe7   :  { %v255_v39 = vadd.f32 1.0, %v2149_v38 }
  0xe8   :  { %v2151_v40 = vpop.eup %2150 }
  0xe9   :  { %v254_v41 = vadd.f32 1.0, %v2151_v40  ;;  %2152 = vrcp.f32 %v255_v39 }
  0xeb   :  { %2154 = vrcp.f32 %v254_v41 }
  0xf6   :  { %v2153_v42 = vpop.eup %2152 }
  0xf7   :  { %v281_v58 = vsub.f32 1.0, %v2153_v42 }
  0xf8   :  { %v2155_v46 = vpop.eup %2154 }
  0xf9   :  { %v280_v0 = vsub.f32 1.0, %v2155_v46 }
 0x144   :  { %v263_v43 = vpop.permute.xlu0 %262 }
 0x145   :  { %v267_v44 = vmul.f32 %v2153_v42, %v263_v43 }
 0x147   :  { %272 = vrot.lane.b32.xlu1 %v267_v44, %s2319_s27 }
 0x148   :  { %v261_v47 = vpop.permute.xlu0 %260 }
 0x149   :  { %v266_v48 = vmul.f32 %v2155_v46, %v261_v47 }
 0x14b   :  { %270 = vrot.lane.b32.xlu1 %v266_v48, %s2319_s27 }
 0x14f   :  { %302 = vrot.lane.b32.xlu1 %v299_v49, %s2320_s5 }
 0x153   :  { %300 = vrot.lane.b32.xlu1 %v295_v50, %s2320_s5 }
 0x1b9   :  { %v273_v51 = vpop.permute.xlu1 %272 }
 0x1ba   :  { %v277_v52 = vadd.f32 %v273_v51, %v146_v32 }
 0x1bc   :  { %2156 = vtanh.f32 %v277_v52 }
 0x1bd   :  { %v271_v53 = vpop.permute.xlu1 %270 }
 0x1be   :  { %v276_v54 = vadd.f32 %v271_v53, %v145_v34 }
 0x1c0   :  { %2158 = vtanh.f32 %v276_v54 }
 0x1c1   :  { %v303_v57 = vpop.permute.xlu1 %302 }
 0x1c2   :  { %v307_v60 = vmul.f32 %v2153_v42, %v303_v57  ;;  %v464_v57 = vld [vmem:[#allocation2 + $0x2] sm:$0x1] }
 0x1c5   :  { %v301_v62 = vpop.permute.xlu1 %300 }
 0x1c6   :  { %v306_v3 = vmul.f32 %v2155_v46, %v301_v62 }
 0x1c9   :  { %v2157_v55 = vpop.eup %2156 }
 0x1ca   :  { %286 = vrot.lane.b32.xlu0 %v2157_v55, %s2321_s6 }
 0x1cd   :  { %v2159_v56 = vpop.eup %2158 }
 0x1ce   :  { %284 = vrot.lane.b32.xlu0 %v2159_v56, %s2321_s6 }
 0x23c   :  { %v287_v59 = vpop.permute.xlu0 %286 }
 0x23d   :  { %v291_v61 = vmul.f32 %v287_v59, %v281_v58  ;;  %v465_v59 = vld [vmem:[#allocation2 + $0xa] sm:$0x1] }
 0x23f   :  { %v2500_v63 = vadd.f32 %v307_v60, %v291_v61 }
 0x240   :  { %v285_v1 = vpop.permute.xlu0 %284 }
 0x241   :  { %v290_v6 = vmul.f32 %v285_v1, %v280_v0  ;;  %v323_v8 = vrot.slane %v2500_v63, 7 }
 0x243   :  { %v2502_v7 = vadd.f32 %v306_v3, %v290_v6 }
 0x245   :  { %v325_v9 = vsel %vm324_vm3, %v323_v8, %v2502_v7 }
 0x246   :  { %326 = vrot.lane.b32.xlu0 %v325_v9, %s2321_s6 }
 0x2b8   :  { %v327_v10 = vpop.permute.xlu0 %326 }
 0x2b9   :  { %2017 = vmatmul.mubr.msk.f32.vlgmr.msra.gmra.mxu0 %vm53_vm0, %v327_v10 }
 0x2ba   :  { %2031 = vmatpush3.msra.mxu0 %v2403_v2  ;;  %2038 = vmatprep.mubr.msk.f32.mxu0 %vm2318_vm1, %v2316_v4 }
 0x2bb   :  { %2032 = vmatprep.subr.mxu0 %v2316_v4 }
 0x2bc   :  { %2033 = vmatpush3.msra.mxu0 %v2409_v5 }
 0x2bd   :  { %2034 = vmatprep.subr.mxu0 %v2316_v4 }
 0x2be   :  { %2035 = vmatpush3.msra.mxu0 %v2438_v14 }
 0x2bf   :  { %2036 = vmatprep.subr.mxu0 %v2316_v4 }
 0x2c0   :  { %2037 = vmatpush3.msra.mxu0 %v2450_v18 }
 0x2c1   :  { %2052 = vmatprep.subr.mxu0 %v2316_v4 }
 0x379   :  { %v396_v11 = vpop.f32.mrf.mxu0 }
 0x37a   :  { %v397_v12 = vadd.f32 %v2488_v25, %v396_v11 }
 0x37b   :  { %v2018_v13 = vpop.f32.mrf.mxu0 }
 0x37c   :  { %418 = vrot.lane.b32.xlu0 %v397_v12, %s2319_s27  ;;  %v401_v15 = vrot.slane %v397_v12, 1  ;;  %v404_v17 = vadd.f32 %v397_v12, %v321_v16 }
 0x37e   :  { %420 = vrot.lane.b32.xlu1 %v401_v15, %s2319_s27  ;;  %v405_v20 = vadd.f32 %v401_v15, %v322_v19  ;;  %v1883_v21 = vmul.f32 -1.442695, %v404_v17 }
 0x380   :  { %v1884_v22 = vmul.f32 -1.442695, %v405_v20  ;;  %2160 = vpow2.f32 %v1883_v21 }
 0x382   :  { %2162 = vpow2.f32 %v1884_v22 }
 0x38d   :  { %v2161_v23 = vpop.eup %2160 }
 0x38e   :  { %v412_v26 = vadd.f32 1.0, %v2161_v23 }
 0x38f   :  { %v2163_v24 = vpop.eup %2162 }
 0x390   :  { %v413_v27 = vadd.f32 1.0, %v2163_v24  ;;  %2164 = vrcp.f32 %v412_v26 }
 0x392   :  { %2166 = vrcp.f32 %v413_v27 }
 0x39d   :  { %v2165_v28 = vpop.eup %2164 }
 0x39e   :  { %v438_v41 = vsub.f32 1.0, %v2165_v28  ;;  %v450_v47 = vmul.f32 %v2165_v28, %v2502_v7 }
 0x39f   :  { %v2167_v31 = vpop.eup %2166 }
 0x3a0   :  { %v439_v42 = vsub.f32 1.0, %v2167_v31  ;;  %v451_v45 = vmul.f32 %v2167_v31, %v2500_v63 }
 0x3ee   :  { %v419_v29 = vpop.permute.xlu0 %418 }
 0x3ef   :  { %v424_v30 = vmul.f32 %v2165_v28, %v419_v29 }
 0x3f0   :  { %v421_v32 = vpop.permute.xlu1 %420 }
 0x3f1   :  { %v425_v33 = vmul.f32 %v2167_v31, %v421_v32  ;;  %428 = vrot.lane.b32.xlu0 %v424_v30, %s2319_s27 }
 0x3f3   :  { %430 = vrot.lane.b32.xlu1 %v425_v33, %s2319_s27 }
 0x463   :  { %v429_v34 = vpop.permute.xlu0 %428 }
 0x464   :  { %v434_v35 = vadd.f32 %v429_v34, %v321_v16 }
 0x465   :  { %v431_v36 = vpop.permute.xlu1 %430 }
 0x466   :  { %2168 = vtanh.f32 %v434_v35  ;;  %v435_v37 = vadd.f32 %v431_v36, %v322_v19 }
 0x468   :  { %2170 = vtanh.f32 %v435_v37 }
 0x473   :  { %v2169_v38 = vpop.eup %2168 }
 0x474   :  { %442 = vrot.lane.b32.xlu0 %v2169_v38, %s2321_s6 }
 0x475   :  { %v2171_v39 = vpop.eup %2170 }
 0x476   :  { %444 = vrot.lane.b32.xlu1 %v2171_v39, %s2321_s6 }
 0x4e6   :  { %v443_v40 = vpop.permute.xlu0 %442 }
 0x4e7   :  { %v448_v44 = vmul.f32 %v443_v40, %v438_v41  ;;  %v606_v40 = vld [vmem:[#allocation2 + $0x3] sm:$0x1] }
 0x4e8   :  { %v445_v43 = vpop.permute.xlu1 %444 }
 0x4e9   :  { %v449_v46 = vmul.f32 %v445_v43, %v439_v42  ;;  %v2530_v49 = vadd.f32 %v450_v47, %v448_v44  ;;  %v607_v42 = vld [vmem:[#allocation2 + $0xb] sm:$0x1] }
 0x4eb   :  { %v2528_v48 = vadd.f32 %v451_v45, %v449_v46 }
 0x4ed   :  { %v466_v50 = vrot.slane %v2528_v48, 7 }
 0x4ef   :  { %v467_v51 = vsel %vm324_vm3, %v466_v50, %v2530_v49 }
 0x4f0   :  { %468 = vrot.lane.b32.xlu1 %v467_v51, %s2321_s6 }
 0x562   :  { %v469_v52 = vpop.permute.xlu1 %468 }
 0x563   :  { %2028 = vmatmul.mubr.msk.f32.vlgmr.msra.gmra.mxu1 %vm53_vm0, %v469_v52 }
 0x564   :  { %2042 = vmatpush3.msra.mxu1 %v2403_v2  ;;  %2049 = vmatprep.mubr.msk.f32.mxu1 %vm2318_vm1, %v2316_v4 }
 0x565   :  { %2043 = vmatprep.subr.mxu1 %v2316_v4 }
 0x566   :  { %2044 = vmatpush3.msra.mxu1 %v2409_v5 }
 0x567   :  { %2045 = vmatprep.subr.mxu1 %v2316_v4 }
 0x568   :  { %2046 = vmatpush3.msra.mxu1 %v2438_v14 }
 0x569   :  { %2047 = vmatprep.subr.mxu1 %v2316_v4 }
 0x56a   :  { %2048 = vmatpush3.msra.mxu1 %v2450_v18 }
 0x56b   :  { %2063 = vmatprep.subr.mxu1 %v2316_v4 }
 0x623   :  { %v538_v53 = vpop.f32.mrf.mxu1 }
 0x624   :  { %v539_v54 = vadd.f32 %v2488_v25, %v538_v53 }
 0x625   :  { %v2029_v55 = vpop.f32.mrf.mxu1 }
 0x626   :  { %560 = vrot.lane.b32.xlu1 %v539_v54, %s2319_s27  ;;  %v543_v56 = vrot.slane %v539_v54, 1  ;;  %v546_v58 = vadd.f32 %v539_v54, %v464_v57 }
 0x628   :  { %562 = vrot.lane.b32.xlu0 %v543_v56, %s2319_s27  ;;  %v547_v60 = vadd.f32 %v543_v56, %v465_v59  ;;  %v1886_v61 = vmul.f32 -1.442695, %v546_v58 }
 0x62a   :  { %v1887_v62 = vmul.f32 -1.442695, %v547_v60  ;;  %2172 = vpow2.f32 %v1886_v61 }
 0x62c   :  { %2174 = vpow2.f32 %v1887_v62 }
 0x637   :  { %v2173_v0 = vpop.eup %2172 }
 0x638   :  { %v554_v3 = vadd.f32 1.0, %v2173_v0 }
 0x639   :  { %v2175_v1 = vpop.eup %2174 }
 0x63a   :  { %v555_v6 = vadd.f32 1.0, %v2175_v1  ;;  %2176 = vrcp.f32 %v554_v3 }
 0x63c   :  { %2178 = vrcp.f32 %v555_v6 }
 0x647   :  { %v2177_v8 = vpop.eup %2176 }
 0x648   :  { %v580_v23 = vsub.f32 1.0, %v2177_v8  ;;  %v592_v30 = vmul.f32 %v2177_v8, %v2530_v49 }
 0x649   :  { %v2179_v11 = vpop.eup %2178 }
 0x64a   :  { %v581_v24 = vsub.f32 1.0, %v2179_v11  ;;  %v593_v28 = vmul.f32 %v2179_v11, %v2528_v48 }
 0x698   :  { %v561_v9 = vpop.permute.xlu1 %560 }
 0x699   :  { %v566_v10 = vmul.f32 %v2177_v8, %v561_v9 }
 0x69a   :  { %v563_v12 = vpop.permute.xlu0 %562 }
 0x69b   :  { %v567_v13 = vmul.f32 %v2179_v11, %v563_v12  ;;  %570 = vrot.lane.b32.xlu1 %v566_v10, %s2319_s27 }
 0x69d   :  { %572 = vrot.lane.b32.xlu0 %v567_v13, %s2319_s27 }
 0x70d   :  { %v571_v15 = vpop.permute.xlu1 %570 }
 0x70e   :  { %v576_v16 = vadd.f32 %v571_v15, %v464_v57 }
 0x70f   :  { %v573_v17 = vpop.permute.xlu0 %572 }
 0x710   :  { %2180 = vtanh.f32 %v576_v16  ;;  %v577_v19 = vadd.f32 %v573_v17, %v465_v59 }
 0x712   :  { %2182 = vtanh.f32 %v577_v19 }
 0x71d   :  { %v2181_v20 = vpop.eup %2180 }
 0x71e   :  { %584 = vrot.lane.b32.xlu1 %v2181_v20, %s2321_s6 }
 0x71f   :  { %v2183_v21 = vpop.eup %2182 }
 0x720   :  { %586 = vrot.lane.b32.xlu0 %v2183_v21, %s2321_s6 }
 0x790   :  { %v585_v22 = vpop.permute.xlu1 %584 }
 0x791   :  { %v590_v27 = vmul.f32 %v585_v22, %v580_v23 }
 0x792   :  { %v587_v26 = vpop.permute.xlu0 %586 }
 0x793   :  { %v591_v29 = vmul.f32 %v587_v26, %v581_v24  ;;  %v2558_v32 = vadd.f32 %v592_v30, %v590_v27  ;;  %v748_v24 = vld [vmem:[#allocation2 + $0x4] sm:$0x1]  ;;  %v749_v27 = vld [vmem:[#allocation2 + $0xc] sm:$0x1] }
 0x795   :  { %v2556_v31 = vadd.f32 %v593_v28, %v591_v29 }
 0x797   :  { %v608_v33 = vrot.slane %v2556_v31, 7 }
 0x799   :  { %v609_v34 = vsel %vm324_vm3, %v608_v33, %v2558_v32 }
 0x79a   :  { %610 = vrot.lane.b32.xlu0 %v609_v34, %s2321_s6 }
 0x80c   :  { %v611_v35 = vpop.permute.xlu0 %610 }
 0x80d   :  { %2039 = vmatmul.mubr.msk.f32.vlgmr.msra.gmra.mxu0 %vm53_vm0, %v611_v35 }
 0x80e   :  { %2053 = vmatpush3.msra.mxu0 %v2403_v2  ;;  %2060 = vmatprep.mubr.msk.f32.mxu0 %vm2318_vm1, %v2316_v4 }
 0x80f   :  { %2054 = vmatprep.subr.mxu0 %v2316_v4 }
 0x810   :  { %2055 = vmatpush3.msra.mxu0 %v2409_v5 }
 0x811   :  { %2056 = vmatprep.subr.mxu0 %v2316_v4 }
 0x812   :  { %2057 = vmatpush3.msra.mxu0 %v2438_v14 }
 0x813   :  { %2058 = vmatprep.subr.mxu0 %v2316_v4 }
 0x814   :  { %2059 = vmatpush3.msra.mxu0 %v2450_v18 }
 0x815   :  { %2074 = vmatprep.subr.mxu0 %v2316_v4 }
 0x8cd   :  { %v680_v36 = vpop.f32.mrf.mxu0 }
 0x8ce   :  { %v681_v37 = vadd.f32 %v2488_v25, %v680_v36 }
 0x8cf   :  { %v2040_v38 = vpop.f32.mrf.mxu0 }
 0x8d0   :  { %702 = vrot.lane.b32.xlu0 %v681_v37, %s2319_s27  ;;  %v685_v39 = vrot.slane %v681_v37, 1  ;;  %v688_v41 = vadd.f32 %v681_v37, %v606_v40 }
 0x8d2   :  { %704 = vrot.lane.b32.xlu1 %v685_v39, %s2319_s27  ;;  %v689_v43 = vadd.f32 %v685_v39, %v607_v42  ;;  %v1889_v44 = vmul.f32 -1.442695, %v688_v41 }
 0x8d4   :  { %v1890_v45 = vmul.f32 -1.442695, %v689_v43  ;;  %2184 = vpow2.f32 %v1889_v44 }
 0x8d6   :  { %2186 = vpow2.f32 %v1890_v45 }
 0x8e1   :  { %v2185_v46 = vpop.eup %2184 }
 0x8e2   :  { %v696_v50 = vadd.f32 1.0, %v2185_v46 }
 0x8e3   :  { %v2187_v47 = vpop.eup %2186 }
 0x8e4   :  { %v697_v51 = vadd.f32 1.0, %v2187_v47  ;;  %2188 = vrcp.f32 %v696_v50 }
 0x8e6   :  { %2190 = vrcp.f32 %v697_v51 }
 0x8f1   :  { %v2189_v52 = vpop.eup %2188 }
 0x8f2   :  { %v722_v3 = vsub.f32 1.0, %v2189_v52  ;;  %v734_v12 = vmul.f32 %v2189_v52, %v2558_v32 }
 0x8f3   :  { %v2191_v55 = vpop.eup %2190 }
 0x8f4   :  { %v723_v6 = vsub.f32 1.0, %v2191_v55  ;;  %v735_v10 = vmul.f32 %v2191_v55, %v2556_v31 }
 0x942   :  { %v703_v53 = vpop.permute.xlu0 %702 }
 0x943   :  { %v708_v54 = vmul.f32 %v2189_v52, %v703_v53 }
 0x944   :  { %v705_v56 = vpop.permute.xlu1 %704 }
 0x945   :  { %v709_v57 = vmul.f32 %v2191_v55, %v705_v56  ;;  %712 = vrot.lane.b32.xlu0 %v708_v54, %s2319_s27 }
 0x947   :  { %714 = vrot.lane.b32.xlu1 %v709_v57, %s2319_s27 }
 0x9b7   :  { %v713_v58 = vpop.permute.xlu0 %712 }
 0x9b8   :  { %v718_v59 = vadd.f32 %v713_v58, %v606_v40 }
 0x9b9   :  { %v715_v60 = vpop.permute.xlu1 %714 }
 0x9ba   :  { %2192 = vtanh.f32 %v718_v59  ;;  %v719_v61 = vadd.f32 %v715_v60, %v607_v42 }
 0x9bc   :  { %2194 = vtanh.f32 %v719_v61 }
 0x9c7   :  { %v2193_v62 = vpop.eup %2192 }
 0x9c8   :  { %726 = vrot.lane.b32.xlu0 %v2193_v62, %s2321_s6 }
 0x9c9   :  { %v2195_v0 = vpop.eup %2194 }
 0x9ca   :  { %728 = vrot.lane.b32.xlu1 %v2195_v0, %s2321_s6 }
 0xa3a   :  { %v727_v1 = vpop.permute.xlu0 %726 }
 0xa3b   :  { %v732_v9 = vmul.f32 %v727_v1, %v722_v3 }
 0xa3c   :  { %v729_v8 = vpop.permute.xlu1 %728 }
 0xa3d   :  { %v733_v11 = vmul.f32 %v729_v8, %v723_v6  ;;  %v2586_v15 = vadd.f32 %v734_v12, %v732_v9  ;;  %v891_v9 = vld [vmem:[#allocation2 + $0xd] sm:$0x1] }
 0xa3f   :  { %v2584_v13 = vadd.f32 %v735_v10, %v733_v11 }
 0xa41   :  { %v750_v16 = vrot.slane %v2584_v13, 7 }
 0xa43   :  { %v751_v17 = vsel %vm324_vm3, %v750_v16, %v2586_v15 }
 0xa44   :  { %752 = vrot.lane.b32.xlu1 %v751_v17, %s2321_s6 }
 0xab6   :  { %v753_v19 = vpop.permute.xlu1 %752 }
 0xab7   :  { %2050 = vmatmul.mubr.msk.f32.vlgmr.msra.gmra.mxu1 %vm53_vm0, %v753_v19 }
 0xab8   :  { %2064 = vmatpush3.msra.mxu1 %v2403_v2  ;;  %2071 = vmatprep.mubr.msk.f32.mxu1 %vm2318_vm1, %v2316_v4 }
 0xab9   :  { %2065 = vmatprep.subr.mxu1 %v2316_v4 }
 0xaba   :  { %2066 = vmatpush3.msra.mxu1 %v2409_v5 }
 0xabb   :  { %2067 = vmatprep.subr.mxu1 %v2316_v4 }
 0xabc   :  { %2068 = vmatpush3.msra.mxu1 %v2438_v14 }
 0xabd   :  { %2069 = vmatprep.subr.mxu1 %v2316_v4 }
 0xabe   :  { %2070 = vmatpush3.msra.mxu1 %v2450_v18 }
 0xabf   :  { %2085 = vmatprep.subr.mxu1 %v2316_v4 }
 0xb77   :  { %v822_v20 = vpop.f32.mrf.mxu1 }
 0xb78   :  { %v823_v21 = vadd.f32 %v2488_v25, %v822_v20 }
 0xb79   :  { %v2051_v22 = vpop.f32.mrf.mxu1 }
 0xb7a   :  { %844 = vrot.lane.b32.xlu1 %v823_v21, %s2319_s27  ;;  %v827_v23 = vrot.slane %v823_v21, 1  ;;  %v830_v26 = vadd.f32 %v823_v21, %v748_v24 }
 0xb7c   :  { %846 = vrot.lane.b32.xlu0 %v827_v23, %s2319_s27  ;;  %v831_v28 = vadd.f32 %v827_v23, %v749_v27  ;;  %v1892_v29 = vmul.f32 -1.442695, %v830_v26 }
 0xb7e   :  { %v1893_v30 = vmul.f32 -1.442695, %v831_v28  ;;  %2196 = vpow2.f32 %v1892_v29 }
 0xb80   :  { %2198 = vpow2.f32 %v1893_v30 }
 0xb8b   :  { %v2197_v33 = vpop.eup %2196 }
 0xb8c   :  { %v838_v35 = vadd.f32 1.0, %v2197_v33 }
 0xb8d   :  { %v2199_v34 = vpop.eup %2198 }
 0xb8e   :  { %v839_v36 = vadd.f32 1.0, %v2199_v34  ;;  %2200 = vrcp.f32 %v838_v35 }
 0xb90   :  { %2202 = vrcp.f32 %v839_v36 }
 0xb9b   :  { %v2201_v37 = vpop.eup %2200 }
 0xb9c   :  { %v864_v52 = vsub.f32 1.0, %v2201_v37  ;;  %v876_v58 = vmul.f32 %v2201_v37, %v2586_v15 }
 0xb9d   :  { %v2203_v40 = vpop.eup %2202 }
 0xb9e   :  { %v865_v53 = vsub.f32 1.0, %v2203_v40  ;;  %v877_v56 = vmul.f32 %v2203_v40, %v2584_v13 }
 0xbec   :  { %v845_v38 = vpop.permute.xlu1 %844 }
 0xbed   :  { %v850_v39 = vmul.f32 %v2201_v37, %v845_v38 }
 0xbee   :  { %v847_v41 = vpop.permute.xlu0 %846 }
 0xbef   :  { %v851_v42 = vmul.f32 %v2203_v40, %v847_v41  ;;  %854 = vrot.lane.b32.xlu1 %v850_v39, %s2319_s27 }
 0xbf1   :  { %856 = vrot.lane.b32.xlu0 %v851_v42, %s2319_s27 }
 0xc61   :  { %v855_v43 = vpop.permute.xlu1 %854 }
 0xc62   :  { %v860_v44 = vadd.f32 %v855_v43, %v748_v24 }
 0xc63   :  { %v857_v45 = vpop.permute.xlu0 %856 }
 0xc64   :  { %2204 = vtanh.f32 %v860_v44  ;;  %v861_v46 = vadd.f32 %v857_v45, %v749_v27 }
 0xc66   :  { %2206 = vtanh.f32 %v861_v46 }
 0xc71   :  { %v2205_v47 = vpop.eup %2204 }
 0xc72   :  { %868 = vrot.lane.b32.xlu1 %v2205_v47, %s2321_s6 }
 0xc73   :  { %v2207_v50 = vpop.eup %2206 }
 0xc74   :  { %870 = vrot.lane.b32.xlu0 %v2207_v50, %s2321_s6 }
 0xce4   :  { %v869_v51 = vpop.permute.xlu1 %868 }
 0xce5   :  { %v874_v55 = vmul.f32 %v869_v51, %v864_v52 }
 0xce6   :  { %v871_v54 = vpop.permute.xlu0 %870 }
 0xce7   :  { %v875_v57 = vmul.f32 %v871_v54, %v865_v53  ;;  %v2614_v60 = vadd.f32 %v876_v58, %v874_v55  ;;  %v1032_v53 = vld [vmem:[#allocation2 + $0x6] sm:$0x1]  ;;  %v1033_v55 = vld [vmem:[#allocation2 + $0xe] sm:$0x1] }
 0xce9   :  { %v2612_v59 = vadd.f32 %v877_v56, %v875_v57 }
 0xceb   :  { %v892_v61 = vrot.slane %v2612_v59, 7 }
 0xced   :  { %v893_v62 = vsel %vm324_vm3, %v892_v61, %v2614_v60 }
 0xcee   :  { %894 = vrot.lane.b32.xlu0 %v893_v62, %s2321_s6 }
 0xd60   :  { %v895_v0 = vpop.permute.xlu0 %894 }
 0xd61   :  { %2061 = vmatmul.mubr.msk.f32.vlgmr.msra.gmra.mxu0 %vm53_vm0, %v895_v0 }
 0xd62   :  { %2075 = vmatpush3.msra.mxu0 %v2403_v2  ;;  %2082 = vmatprep.mubr.msk.f32.mxu0 %vm2318_vm1, %v2316_v4 }
 0xd63   :  { %2076 = vmatprep.subr.mxu0 %v2316_v4 }
 0xd64   :  { %2077 = vmatpush3.msra.mxu0 %v2409_v5  ;;  %v890_v5 = vld [vmem:[#allocation2 + $0x5] sm:$0x1] }
 0xd65   :  { %2078 = vmatprep.subr.mxu0 %v2316_v4 }
 0xd66   :  { %2079 = vmatpush3.msra.mxu0 %v2438_v14 }
 0xd67   :  { %2080 = vmatprep.subr.mxu0 %v2316_v4 }
 0xd68   :  { %2081 = vmatpush3.msra.mxu0 %v2450_v18 }
 0xd69   :  { %2092 = vmatprep.subr.mxu0 %v2316_v4 }
 0xe21   :  { %v964_v1 = vpop.f32.mrf.mxu0 }
 0xe22   :  { %v965_v2 = vadd.f32 %v2488_v25, %v964_v1 }
 0xe23   :  { %v2062_v3 = vpop.f32.mrf.mxu0 }
 0xe24   :  { %986 = vrot.lane.b32.xlu0 %v965_v2, %s2319_s27  ;;  %v969_v6 = vrot.slane %v965_v2, 1  ;;  %v972_v8 = vadd.f32 %v965_v2, %v890_v5 }
 0xe26   :  { %988 = vrot.lane.b32.xlu1 %v969_v6, %s2319_s27  ;;  %v973_v10 = vadd.f32 %v969_v6, %v891_v9  ;;  %v1895_v14 = vmul.f32 -1.442695, %v972_v8 }
 0xe28   :  { %v1896_v11 = vmul.f32 -1.442695, %v973_v10  ;;  %2208 = vpow2.f32 %v1895_v14 }
 0xe2a   :  { %2210 = vpow2.f32 %v1896_v11 }
 0xe35   :  { %v2209_v18 = vpop.eup %2208 }
 0xe36   :  { %v980_v16 = vadd.f32 1.0, %v2209_v18 }
 0xe37   :  { %v2211_v12 = vpop.eup %2210 }
 0xe38   :  { %v981_v17 = vadd.f32 1.0, %v2211_v12  ;;  %2212 = vrcp.f32 %v980_v16 }
 0xe3a   :  { %2214 = vrcp.f32 %v981_v17 }
 0xe45   :  { %v2213_v19 = vpop.eup %2212 }
 0xe46   :  { %v1006_v35 = vsub.f32 1.0, %v2213_v19  ;;  %v1018_v41 = vmul.f32 %v2213_v19, %v2614_v60 }
 0xe47   :  { %v2215_v22 = vpop.eup %2214 }
 0xe48   :  { %v1007_v36 = vsub.f32 1.0, %v2215_v22  ;;  %v1019_v39 = vmul.f32 %v2215_v22, %v2612_v59 }
 0xe96   :  { %v987_v20 = vpop.permute.xlu0 %986 }
 0xe97   :  { %v992_v21 = vmul.f32 %v2213_v19, %v987_v20 }
 0xe98   :  { %v989_v23 = vpop.permute.xlu1 %988 }
 0xe99   :  { %v993_v24 = vmul.f32 %v2215_v22, %v989_v23  ;;  %996 = vrot.lane.b32.xlu0 %v992_v21, %s2319_s27 }
 0xe9b   :  { %998 = vrot.lane.b32.xlu1 %v993_v24, %s2319_s27 }
 0xf0b   :  { %v997_v26 = vpop.permute.xlu0 %996 }
 0xf0c   :  { %v1002_v27 = vadd.f32 %v997_v26, %v890_v5 }
 0xf0d   :  { %v999_v28 = vpop.permute.xlu1 %998 }
 0xf0e   :  { %2216 = vtanh.f32 %v1002_v27  ;;  %v1003_v29 = vadd.f32 %v999_v28, %v891_v9 }
 0xf10   :  { %2218 = vtanh.f32 %v1003_v29 }
 0xf1b   :  { %v2217_v30 = vpop.eup %2216 }
 0xf1c   :  { %1010 = vrot.lane.b32.xlu0 %v2217_v30, %s2321_s6 }
 0xf1d   :  { %v2219_v33 = vpop.eup %2218 }
 0xf1e   :  { %1012 = vrot.lane.b32.xlu1 %v2219_v33, %s2321_s6 }
 0xf8e   :  { %v1011_v34 = vpop.permute.xlu0 %1010 }
 0xf8f   :  { %v1016_v38 = vmul.f32 %v1011_v34, %v1006_v35 }
 0xf90   :  { %v1013_v37 = vpop.permute.xlu1 %1012 }
 0xf91   :  { %v1017_v40 = vmul.f32 %v1013_v37, %v1007_v36  ;;  %v2642_v43 = vadd.f32 %v1018_v41, %v1016_v38  ;;  %v1174_v38 = vld [vmem:[#allocation2 + $0x7] sm:$0x1] }
 0xf93   :  { %v2640_v42 = vadd.f32 %v1019_v39, %v1017_v40  ;;  %v1175_v40 = vld [vmem:[#allocation2 + $0xf] sm:$0x1] }
 0xf95   :  { %v1034_v44 = vrot.slane %v2640_v42, 7 }
 0xf97   :  { %v1035_v45 = vsel %vm324_vm3, %v1034_v44, %v2642_v43 }
 0xf98   :  { %1036 = vrot.lane.b32.xlu1 %v1035_v45, %s2321_s6 }
0x100a   :  { %v1037_v46 = vpop.permute.xlu1 %1036 }
0x100b   :  { %2072 = vmatmul.mubr.msk.f32.vlgmr.msra.gmra.mxu1 %vm53_vm0, %v1037_v46 }
0x100c   :  { %2089 = vmatprep.mubr.msk.f32.mxu1 %vm2318_vm1, %v2316_v4 }
0x10cb   :  { %v1106_v47 = vpop.f32.mrf.mxu1 }
0x10cc   :  { %v1107_v50 = vadd.f32 %v2488_v25, %v1106_v47 }
0x10cd   :  { %v2073_v51 = vpop.f32.mrf.mxu1 }
0x10ce   :  { %1128 = vrot.lane.b32.xlu1 %v1107_v50, %s2319_s27  ;;  %v1111_v52 = vrot.slane %v1107_v50, 1  ;;  %v1114_v54 = vadd.f32 %v1107_v50, %v1032_v53 }
0x10d0   :  { %1130 = vrot.lane.b32.xlu0 %v1111_v52, %s2319_s27  ;;  %v1115_v56 = vadd.f32 %v1111_v52, %v1033_v55  ;;  %v1898_v57 = vmul.f32 -1.442695, %v1114_v54 }
0x10d2   :  { %v1899_v58 = vmul.f32 -1.442695, %v1115_v56  ;;  %2220 = vpow2.f32 %v1898_v57 }
0x10d4   :  { %2222 = vpow2.f32 %v1899_v58 }
0x10df   :  { %v2221_v61 = vpop.eup %2220 }
0x10e0   :  { %v1122_v0 = vadd.f32 1.0, %v2221_v61 }
0x10e1   :  { %v2223_v62 = vpop.eup %2222 }
0x10e2   :  { %v1123_v1 = vadd.f32 1.0, %v2223_v62  ;;  %2224 = vrcp.f32 %v1122_v0 }
0x10e4   :  { %2226 = vrcp.f32 %v1123_v1 }
0x10ef   :  { %v2225_v2 = vpop.eup %2224 }
0x10f0   :  { %v1148_v19 = vsub.f32 1.0, %v2225_v2  ;;  %v1160_v26 = vmul.f32 %v2225_v2, %v2642_v43 }
0x10f1   :  { %v2227_v5 = vpop.eup %2226 }
0x10f2   :  { %v1149_v20 = vsub.f32 1.0, %v2227_v5  ;;  %v1161_v23 = vmul.f32 %v2227_v5, %v2640_v42 }
0x1140   :  { %v1129_v3 = vpop.permute.xlu1 %1128 }
0x1141   :  { %v1134_v6 = vmul.f32 %v2225_v2, %v1129_v3 }
0x1142   :  { %v1131_v8 = vpop.permute.xlu0 %1130 }
0x1143   :  { %v1135_v9 = vmul.f32 %v2227_v5, %v1131_v8  ;;  %1138 = vrot.lane.b32.xlu1 %v1134_v6, %s2319_s27 }
0x1145   :  { %1140 = vrot.lane.b32.xlu0 %v1135_v9, %s2319_s27 }
0x11b5   :  { %v1139_v10 = vpop.permute.xlu1 %1138 }
0x11b6   :  { %v1144_v14 = vadd.f32 %v1139_v10, %v1032_v53 }
0x11b7   :  { %v1141_v11 = vpop.permute.xlu0 %1140 }
0x11b8   :  { %2228 = vtanh.f32 %v1144_v14  ;;  %v1145_v18 = vadd.f32 %v1141_v11, %v1033_v55 }
0x11ba   :  { %2230 = vtanh.f32 %v1145_v18 }
0x11c5   :  { %v2229_v12 = vpop.eup %2228 }
0x11c6   :  { %1152 = vrot.lane.b32.xlu1 %v2229_v12, %s2321_s6 }
0x11c7   :  { %v2231_v16 = vpop.eup %2230 }
0x11c8   :  { %1154 = vrot.lane.b32.xlu0 %v2231_v16, %s2321_s6 }
0x1238   :  { %v1153_v17 = vpop.permute.xlu1 %1152 }
0x1239   :  { %v1158_v22 = vmul.f32 %v1153_v17, %v1148_v19 }
0x123a   :  { %v1155_v21 = vpop.permute.xlu0 %1154 }
0x123b   :  { %v1159_v24 = vmul.f32 %v1155_v21, %v1149_v20  ;;  %v2662_v28 = vadd.f32 %v1160_v26, %v1158_v22 }
0x123d   :  { %v2660_v27 = vadd.f32 %v1161_v23, %v1159_v24 }
0x123f   :  { %v1176_v29 = vrot.slane %v2660_v27, 7 }
0x1241   :  { %v1177_v30 = vsel %vm324_vm3, %v1176_v29, %v2662_v28 }
0x1242   :  { %1178 = vrot.lane.b32.xlu0 %v1177_v30, %s2321_s6 }
0x12b4   :  { %v1179_v33 = vpop.permute.xlu0 %1178 }
0x12b5   :  { %2083 = vmatmul.mubr.msk.f32.vlgmr.msra.gmra.mxu0 %vm53_vm0, %v1179_v33 }
0x12b6   :  { %2096 = vmatprep.mubr.msk.f32.mxu0 %vm2318_vm1, %v2316_v4 }
0x1375   :  { %v1248_v34 = vpop.f32.mrf.mxu0 }
0x1376   :  { %v1249_v35 = vadd.f32 %v2488_v25, %v1248_v34 }
0x1377   :  { %v2084_v36 = vpop.f32.mrf.mxu0 }
0x1378   :  { %1270 = vrot.lane.b32.xlu1 %v1249_v35, %s2319_s27  ;;  %v1253_v37 = vrot.slane %v1249_v35, 1  ;;  %v1256_v39 = vadd.f32 %v1249_v35, %v1174_v38 }
0x137a   :  { %1272 = vrot.lane.b32.xlu0 %v1253_v37, %s2319_s27  ;;  %v1257_v41 = vadd.f32 %v1253_v37, %v1175_v40  ;;  %v1901_v44 = vmul.f32 -1.442695, %v1256_v39 }
0x137c   :  { %v1902_v45 = vmul.f32 -1.442695, %v1257_v41  ;;  %2232 = vpow2.f32 %v1901_v44 }
0x137e   :  { %2234 = vpow2.f32 %v1902_v45 }
0x1389   :  { %v2233_v46 = vpop.eup %2232 }
0x138a   :  { %v1264_v50 = vadd.f32 1.0, %v2233_v46 }
0x138b   :  { %v2235_v47 = vpop.eup %2234 }
0x138c   :  { %v1265_v51 = vadd.f32 1.0, %v2235_v47  ;;  %2236 = vrcp.f32 %v1264_v50  ;;  %v1660_v47 = vld [vmem:[%s2822_s8 + $0x18] sm:$0xff]  ;;  %v1659_v50 = vld [vmem:[%s2822_s8 + $0x10] sm:$0xff] }
0x138e   :  { %2238 = vrcp.f32 %v1265_v51 }
0x1399   :  { %v2237_v25 = vpop.eup %2236 }
0x139b   :  { %v2239_v54 = vpop.eup %2238 }
0x139c   :  { %v1303_v3 = vmul.f32 %v2239_v54, %v2660_v27 }
0x13ea   :  { %v1271_v52 = vpop.permute.xlu1 %1270 }
0x13eb   :  { %v1276_v53 = vmul.f32 %v2237_v25, %v1271_v52 }
0x13ec   :  { %v1273_v55 = vpop.permute.xlu0 %1272 }
0x13ed   :  { %v1277_v56 = vmul.f32 %v2239_v54, %v1273_v55  ;;  %1280 = vrot.lane.b32.xlu1 %v1276_v53, %s2319_s27  ;;  %v1656_v55 = vld [vmem:[%s2821_s7 + $0x18] sm:$0xff] }
0x13ef   :  { %1282 = vrot.lane.b32.xlu0 %v1277_v56, %s2319_s27 }
0x145f   :  { %v1281_v57 = vpop.permute.xlu1 %1280 }
0x1460   :  { %v1286_v58 = vadd.f32 %v1281_v57, %v1174_v38  ;;  %v1655_v57 = vld [vmem:[%s2821_s7 + $0x10] sm:$0xff] }
0x1461   :  { %v1283_v61 = vpop.permute.xlu0 %1282 }
0x1462   :  { %2240 = vtanh.f32 %v1286_v58  ;;  %v1287_v62 = vadd.f32 %v1283_v61, %v1175_v40  ;;  %v1654_v58 = vld [vmem:[%s2821_s7 + $0x8] sm:$0xff] }
0x1463   :  { %v1658_v61 = vld [vmem:[%s2822_s8 + $0x8] sm:$0xff] }
0x1464   :  { %2242 = vtanh.f32 %v1287_v62  ;;  %v1657_v62 = vld [vmem:[%s2822_s8] sm:$0xff] }
0x146f   :  { %v2241_v0 = vpop.eup %2240 }
0x1470   :  { %1294 = vrot.lane.b32.xlu1 %v2241_v0, %s2321_s6 }
0x1471   :  { %v2243_v1 = vpop.eup %2242 }
0x1472   :  { %1296 = vrot.lane.b32.xlu0 %v2243_v1, %s2321_s6 }
0x1474   :  { %312 = vrot.lane.b32.xlu1 %v2502_v7, %s2321_s6  ;;  %v1321_v7 = vld [vmem:[%s2815_s1 + $0x8] sm:$0xff] }
0x1475   :  { %2086 = vmatpush3.xpose.msk.msra.mxu1 %vm53_vm0, %v1321_v7 }
0x1476   :  { %456 = vrot.lane.b32.xlu0 %v2530_v49, %s2321_s6  ;;  %2087 = vmatprep.subr.mxu1 %v2316_v4  ;;  %v1290_v49 = vsub.f32 1.0, %v2237_v25 }
0x1478   :  { %598 = vrot.lane.b32.xlu1 %v2558_v32, %s2321_s6  ;;  %v2727_v32 = vld [vmem:[%s2815_s1 + $0x10] sm:$0xff] }
0x147a   :  { %740 = vrot.lane.b32.xlu0 %v2586_v15, %s2321_s6 }
0x147c   :  { %882 = vrot.lane.b32.xlu1 %v2614_v60, %s2321_s6 }
0x147e   :  { %1024 = vrot.lane.b32.xlu0 %v2642_v43, %s2321_s6 }
0x1480   :  { %1166 = vrot.lane.b32.xlu1 %v2662_v28, %s2321_s6 }
0x1482   :  { %458 = vrot.lane.b32.xlu0 %v2528_v48, %s2321_s6  ;;  %v2717_v48 = vld [vmem:[%s2815_s1 + $0x18] sm:$0xff] }
0x1483   :  { %2093 = vmatpush3.xpose.msk.msra.mxu0 %vm53_vm0, %v2717_v48 }
0x1484   :  { %314 = vrot.lane.b32.xlu1 %v2500_v63, %s2321_s6  ;;  %v1320_v63 = vld [vmem:[%s2815_s1] sm:$0xff]  ;;  %2094 = vmatprep.subr.mxu0 %v2316_v4 }
0x1485   :  { %2088 = vmatpush3.xpose.msk.msra.mxu1 %vm53_vm0, %v1320_v63 }
0x1486   :  { %742 = vrot.lane.b32.xlu0 %v2584_v13, %s2321_s6  ;;  %2099 = vmatprep.subr.mxu1 %v2316_v4  ;;  %v1302_v13 = vmul.f32 %v2237_v25, %v2662_v28 }
0x1487   :  { %2095 = vmatpush3.xpose.msk.msra.mxu0 %vm53_vm0, %v2727_v32 }
0x1488   :  { %600 = vrot.lane.b32.xlu1 %v2556_v31, %s2321_s6  ;;  %2113 = vmatprep.subr.mxu0 %v1660_v47 }
0x148a   :  { %1026 = vrot.lane.b32.xlu0 %v2640_v42, %s2321_s6 }
0x148c   :  { %884 = vrot.lane.b32.xlu1 %v2612_v59, %s2321_s6  ;;  %v1291_v59 = vsub.f32 1.0, %v2239_v54 }
0x1490   :  { %1168 = vrot.lane.b32.xlu1 %v2660_v27, %s2321_s6 }
0x14e2   :  { %v1295_v31 = vpop.permute.xlu1 %1294 }
0x14e3   :  { %v1300_v15 = vmul.f32 %v1295_v31, %v1290_v49 }
0x14e4   :  { %v1297_v60 = vpop.permute.xlu0 %1296 }
0x14e5   :  { %v1304_v42 = vadd.f32 %v1302_v13, %v1300_v15  ;;  %v1301_v43 = vmul.f32 %v1297_v60, %v1291_v59 }
0x14e6   :  { %v313_v2 = vpop.permute.xlu1 %312 }
0x14e7   :  { %319 = vst.msk [vmem:[#allocation3] sm:$0x1] %vm318_vm4, %v313_v2  ;;  %1308 = vrot.lane.b32.xlu0 %v1304_v42, %s2321_s6  ;;  %v1305_v5 = vadd.f32 %v1303_v3, %v1301_v43 }
0x14e8   :  { %v457_v6 = vpop.permute.xlu0 %456 }
0x14e9   :  { %462 = vst.msk [vmem:[#allocation3 + $0x1] sm:$0x1] %vm318_vm4, %v457_v6 }
0x14ea   :  { %v599_v8 = vpop.permute.xlu1 %598 }
0x14eb   :  { %604 = vst.msk [vmem:[#allocation3 + $0x2] sm:$0x1] %vm318_vm4, %v599_v8  ;;  %1310 = vrot.lane.b32.xlu0 %v1305_v5, %s2321_s6 }
0x14ec   :  { %v741_v9 = vpop.permute.xlu0 %740 }
0x14ed   :  { %746 = vst.msk [vmem:[#allocation3 + $0x3] sm:$0x1] %vm318_vm4, %v741_v9 }
0x14ee   :  { %v883_v10 = vpop.permute.xlu1 %882 }
0x14ef   :  { %888 = vst.msk [vmem:[#allocation3 + $0x4] sm:$0x1] %vm318_vm4, %v883_v10 }
0x14f0   :  { %v1025_v14 = vpop.permute.xlu0 %1024 }
0x14f1   :  { %1030 = vst.msk [vmem:[#allocation3 + $0x5] sm:$0x1] %vm318_vm4, %v1025_v14 }
0x14f2   :  { %v1167_v11 = vpop.permute.xlu1 %1166 }
0x14f3   :  { %1172 = vst.msk [vmem:[#allocation3 + $0x6] sm:$0x1] %vm318_vm4, %v1167_v11 }
0x14f4   :  { %v459_v18 = vpop.permute.xlu0 %458 }
0x14f5   :  { %463 = vst.msk [vmem:[#allocation3 + $0x9] sm:$0x1] %vm318_vm4, %v459_v18 }
0x14f6   :  { %v315_v12 = vpop.permute.xlu1 %314 }
0x14f7   :  { %320 = vst.msk [vmem:[#allocation3 + $0x8] sm:$0x1] %vm318_vm4, %v315_v12 }
0x14f8   :  { %v743_v16 = vpop.permute.xlu0 %742 }
0x14f9   :  { %747 = vst.msk [vmem:[#allocation3 + $0xb] sm:$0x1] %vm318_vm4, %v743_v16 }
0x14fa   :  { %v601_v17 = vpop.permute.xlu1 %600 }
0x14fb   :  { %605 = vst.msk [vmem:[#allocation3 + $0xa] sm:$0x1] %vm318_vm4, %v601_v17 }
0x14fc   :  { %v1027_v19 = vpop.permute.xlu0 %1026 }
0x14fd   :  { %1031 = vst.msk [vmem:[#allocation3 + $0xd] sm:$0x1] %vm318_vm4, %v1027_v19 }
0x14fe   :  { %v885_v20 = vpop.permute.xlu1 %884 }
0x14ff   :  { %889 = vst.msk [vmem:[#allocation3 + $0xc] sm:$0x1] %vm318_vm4, %v885_v20 }
0x1502   :  { %v1169_v21 = vpop.permute.xlu1 %1168 }
0x1503   :  { %1173 = vst.msk [vmem:[#allocation3 + $0xe] sm:$0x1] %vm318_vm4, %v1169_v21 }
0x1559   :  { %v1309_v22 = vpop.permute.xlu0 %1308 }
0x155a   :  { %1314 = vst.msk [vmem:[#allocation3 + $0x7] sm:$0x1] %vm318_vm4, %v1309_v22  ;;  %1316 = vst.msk [vmem:[#allocation6] sm:$0x1] %vm318_vm4, %v1309_v22 }
0x155d   :  { %v1311_v23 = vpop.permute.xlu0 %1310 }
0x155e   :  { %1315 = vst.msk [vmem:[#allocation3 + $0xf] sm:$0x1] %vm318_vm4, %v1311_v23  ;;  %1317 = vst.msk [vmem:[#allocation6 + $0x1] sm:$0x1] %vm318_vm4, %v1311_v23 }
0x1561   :  { %v1318_v24 = vld [vmem:[#allocation3] sm:$0xff] }
0x1562   :  { %2090 = vmatmul.mubr.msk.f32.vlgmr.msra.gmra.mxu1 %vm53_vm0, %v1318_v24 }
0x1563   :  { %2100 = vmatpush3.msra.mxu1 %v1321_v7  ;;  %2103 = vmatprep.mubr.msk.f32.mxu1 %vm2318_vm1, %v2316_v4 }
0x1564   :  { %2101 = vmatprep.subr.mxu1 %v2316_v4 }
0x1565   :  { %v1319_v26 = vld [vmem:[#allocation3 + $0x8] sm:$0xff]  ;;  %2102 = vmatpush3.msra.mxu1 %v1320_v63 }
0x1566   :  { %2097 = vmatmul.mubr.msk.f32.vlgmr.msra.gmra.mxu0 %vm53_vm0, %v1319_v26  ;;  %2106 = vmatprep.subr.mxu1 %v2316_v4 }
0x1567   :  { %2114 = vmatpush3.msra.mxu0 %v1660_v47 }
0x1568   :  { %2115 = vmatprep.subr.mxu0 %v1659_v50 }
0x1569   :  { %2116 = vmatpush3.msra.mxu0 %v1659_v50 }
0x156a   :  { %2117 = vmatprep.subr.mxu0 %v1658_v61 }
0x156b   :  { %2118 = vmatpush3.msra.mxu0 %v1658_v61 }
0x156c   :  { %2119 = vmatprep.subr.mxu0 %v1657_v62 }
0x156d   :  { %2120 = vmatpush3.msra.mxu0 %v1657_v62 }
0x1622   :  { %v1399_v27 = vpop.f32.mrf.mxu1 }
0x1623   :  { %v1483_v28 = vsel %vm1482_vm5, %v1399_v27, -inf }
0x1624   :  { %1484 = vmax.xlane.f32.xlu1 %v1483_v28  ;;  %v2091_v29 = vpop.f32.mrf.mxu1 }
0x1626   :  { %v1478_v30 = vpop.f32.mrf.mxu0 }
0x1627   :  { %v1486_v33 = vsel %vm1482_vm5, %v1478_v30, -inf }
0x1628   :  { %1487 = vmax.xlane.f32.xlu0 %v1486_v33  ;;  %v2098_v34 = vpop.f32.mrf.mxu0 }
0x16ad   :  { %v1485_v35 = vpop.xlane.xlu1 %1484 }
0x16ae   :  { %v1489_v36 = vsub.f32 %v1399_v27, %v1485_v35 }
0x16b0   :  { %v1491_v37 = vmul.f32 1.442695, %v1489_v36 }
0x16b1   :  { %v1488_v38 = vpop.xlane.xlu0 %1487 }
0x16b2   :  { %2244 = vpow2.f32 %v1491_v37  ;;  %v1490_v39 = vsub.f32 %v1478_v30, %v1488_v38 }
0x16b4   :  { %v1493_v40 = vmul.f32 1.442695, %v1490_v39 }
0x16b6   :  { %2246 = vpow2.f32 %v1493_v40 }
0x16bf   :  { %v2245_v41 = vpop.eup %2244 }
0x16c0   :  { %v1495_v44 = vsel %vm1482_vm5, %v2245_v41, 0.0 }
0x16c1   :  { %1496 = vadd.xlane.f32.xlu0 %v1495_v44 }
0x16c3   :  { %v2247_v45 = vpop.eup %2246 }
0x16c4   :  { %v1498_v46 = vsel %vm1482_vm5, %v2247_v45, 0.0 }
0x16c5   :  { %1499 = vadd.xlane.f32.xlu1 %v1498_v46 }
0x174a   :  { %v1497_v51 = vpop.xlane.xlu0 %1496 }
0x174b   :  { %2248 = vrcp.f32 %v1497_v51 }
0x174e   :  { %v1500_v25 = vpop.xlane.xlu1 %1499 }
0x174f   :  { %2250 = vrcp.f32 %v1500_v25 }
0x1758   :  { %v2249_v52 = vpop.eup %2248 }
0x1759   :  { %v1503_v53 = vmul.f32 %v2249_v52, %v2245_v41 }
0x175b   :  { %2104 = vmatmul.mubr.msk.f32.vlgmr.msra.gmra.mxu1 %vm1482_vm5, %v1503_v53  ;;  %1505 = vst.msk [vmem:[#allocation8] sm:$0xff] %vm1482_vm5, %v1503_v53 }
0x175c   :  { %v2251_v54 = vpop.eup %2250  ;;  %2107 = vmatpush3.msra.mxu1 %v2717_v48  ;;  %2110 = vmatprep.mubr.msk.f32.mxu1 %vm2318_vm1, %v2316_v4 }
0x175d   :  { %2108 = vmatprep.subr.mxu1 %v2316_v4  ;;  %v1504_v56 = vmul.f32 %v2251_v54, %v2247_v45  ;;  %v1653_v4 = vld [vmem:[%s2821_s7] sm:$0xff]  ;;  %s2322_s7 = smov [#allocation6]  }
0x175e   :  { %2109 = vmatpush3.msra.mxu1 %v2727_v32  ;;  %s1845_s6 = sshll.u32 %s2322_s7, 4  ;;  %s1846_s6 = int_to_ptr.vmem [resolvable:$true] %s1845_s6 }
0x175f   :  { %2124 = vmatprep.subr.mxu1 %v1656_v55  ;;  %2111 = vmatmul.mubr.msk.f32.vlgmr.msra.gmra.mxu1 %vm1482_vm5, %v1504_v56  ;;  %1506 = vst.msk [vmem:[#allocation8 + $0x8] sm:$0xff] %vm1482_vm5, %v1504_v56  ;;  %s2252_s28 = scalar_lea.vmem %s1846_s6, 32  ;;  %p2257_p1 = scmp.lt.s32.totalorder %s1846_s6, %s1846_s6 }
0x1760   :  { %2125 = vmatpush3.msra.mxu1 %v1656_v55  ;;  %2132 = vmatprep.mubr.msk.f32.mxu1 %vm53_vm0, %v1318_v24  ;;  %p2253_p0 = scmp.ne.s32.totalorder %s1846_s6, %s2252_s28  ;;  %p2258_p2 = scmp.lt.s32.totalorder %s2252_s28, %s2252_s28 }
0x1761   :  { %2126 = vmatprep.subr.mxu1 %v1655_v57 }
0x1762   :  { %2127 = vmatpush3.msra.mxu1 %v1655_v57  ;;  %p2259_p3 = por %p2258_p2, %p2257_p1 }
0x1763   :  { %2128 = vmatprep.subr.mxu1 %v1654_v58 }
0x1764   :  { %2129 = vmatpush3.msra.mxu1 %v1654_v58  ;;  %p2260_p4 = pnand %p2259_p3, %p2253_p0 }
0x1765   :  { %2130 = vmatprep.subr.mxu1 %v1653_v4 }
0x1766   :  { %2131 = vmatpush3.msra.mxu1 %v1653_v4 }
0x1767   :  { %2133 = vmatmul.mubr.msk.f32.vlgmr.msra.gmra.mxu1 %vm53_vm0, %v1319_v26 }
0x181b   :  { %v1576_v0 = vpop.f32.mrf.mxu1 }
0x181c   :  { %2121 = vmatprep.mubr.msk.f32.mxu0 %vm53_vm0, %v1576_v0 }
0x181d   :  { %v2105_v1 = vpop.f32.mrf.mxu1 }
0x181f   :  { %v1649_v7 = vpop.f32.mrf.mxu1 }
0x1820   :  { %2122 = vmatmul.mubr.msk.f32.vlgmr.msra.gmra.mxu0 %vm53_vm0, %v1649_v7 }
0x1821   :  { %v2112_v63 = vpop.f32.mrf.mxu1 }
0x1822   :  { %2263 = shalt.err (!%p2260_p4)
}
0x1823   :  { %s2323_s8 = smov 16   ;;  %s2324_s29 = smov 1  }
0x1824   :  { %1851 = dma.vmem_to_hbm [thread:$0]  %s1846_s6, 32, %s2825_s11, [#allocation7], %s2323_s8, %s2323_s8, %s2324_s29  }
0x1825   :  { %s2325_s14 = smov [#allocation8]  }
0x1826   :  { %s1857_s15 = sshll.u32 %s2325_s14, 4  ;;  %s1858_s15 = int_to_ptr.vmem [resolvable:$true] %s1857_s15 }
0x1827   :  { %s2272_s16 = scalar_lea.vmem %s1858_s15, 256  ;;  %p2277_p6 = scmp.lt.s32.totalorder %s1858_s15, %s1858_s15 }
0x1828   :  { %p2273_p5 = scmp.ne.s32.totalorder %s1858_s15, %s2272_s16  ;;  %p2278_p7 = scmp.lt.s32.totalorder %s2272_s16, %s2272_s16 }
0x182a   :  { %p2279_p8 = por %p2278_p7, %p2277_p6 }
0x182c   :  { %p2280_p9 = pnand %p2279_p8, %p2273_p5 }
0x182e   :  { %2283 = shalt.err (!%p2280_p9)
}
0x182f   :  { %s2326_s17 = smov 128   ;;  %s2327_s1 = smov 8   ;;  %v2134_v48 = vpop.f32.mrf.mxu1  ;;  %v1915_v31 = vld [vmem:[%s2823_s9] ss:$0 sm:$0xff] }
0x1830   :  { %1863 = dma.vmem_to_hbm [thread:$0]  %s1858_s15, 256, %s2826_s12, [#allocation7], %s2326_s17, %s2326_s17, %s2327_s1  }
0x1831   :  { %v1808_v13 = vpop.f32.mrf.mxu1  ;;  %s2328_s21 = smov [#allocation4]  }
0x1832   :  { %s1833_s22 = sshll.u32 %s2328_s21, 4  ;;  %s1834_s22 = int_to_ptr.vmem [resolvable:$true] %s1833_s22 }
0x1833   :  { %s2292_s12 = scalar_lea.vmem %s1834_s22, 256  ;;  %p2297_p11 = scmp.lt.s32.totalorder %s1834_s22, %s1834_s22 }
0x1834   :  { %p2293_p10 = scmp.ne.s32.totalorder %s1834_s22, %s2292_s12  ;;  %p2298_p12 = scmp.lt.s32.totalorder %s2292_s12, %s2292_s12 }
0x1836   :  { %p2299_p13 = por %p2298_p12, %p2297_p11 }
0x1838   :  { %p2300_p0 = pnand %p2299_p13, %p2293_p10 }
0x18e0   :  { %v2123_v49 = vpop.f32.mrf.mxu0 }
0x18e1   :  { %v1814_v32 = vadd.f32 %v2134_v48, %v2123_v49 }
0x18e2   :  { %v1733_v15 = vpop.f32.mrf.mxu0 }
0x18e3   :  { %v1825_v59 = vadd.f32 %v1915_v31, %v1814_v32  ;;  %v1809_v60 = vadd.f32 %v1808_v13, %v1733_v15 }
0x18e5   :  { %1827 = vst.msk [vmem:[#allocation4 + $0x8] sm:$0xff] %vm1482_vm5, %v1825_v59  ;;  %v1824_v42 = vadd.f32 %v1915_v31, %v1809_v60 }
0x18e7   :  { %1826 = vst.msk [vmem:[#allocation4] sm:$0xff] %vm1482_vm5, %v1824_v42 }
0x18e8   :  { %2303 = shalt.err (!%p2300_p0)
}
0x18e9   :  { %1839 = dma.vmem_to_hbm [thread:$0]  %s1834_s22, 256, %s2824_s10, [#allocation5], %s2326_s17, %s2326_s17, %s2327_s1  }
0x18ea   :  { %2312 = dma.done.wait [#allocation5], 256  }
0x18eb   :  { %2313 = vsyncadd [#allocation5], 4294967040 }
0x18ec   :  { %2314 = dma.done.wait [#allocation7], 288  }
0x18ed   :  { %2315 = vsyncadd [#allocation7], 4294967008 }
0x18ee   :  { %1873 = vsyncpa [#allocation5], 1 }
0x18ef   :  { %1874 = vsyncpa [#allocation7], 1 }

</bundles_post_ra>
